<compile_context>
chip_gen: v5e
topology: v5e:2x2
jax: 0.10.0
libtpu: 0.0.40
codegen_flags: <defaults>
</compile_context>

<pallas_src>
import math

import jax
import jax.numpy as jnp
from jax.experimental import pallas as pl
from jax.experimental.pallas import tpu as pltpu  # noqa: F401  (kept for parity / future grid use)

# ----------------- small Mistral-like config -----------------
HIDDEN = 32
NUM_HEADS = 4
NUM_KV_HEADS = 2
HEAD_DIM = HIDDEN // NUM_HEADS               # 8
KV_DIM = NUM_KV_HEADS * HEAD_DIM             # 16
NUM_KV_GROUPS = NUM_HEADS // NUM_KV_HEADS    # 2
INTERMEDIATE = 64
RMS_EPS = 1e-6
ROPE_THETA = 10000.0
ATTN_SCALE = 1.0 / math.sqrt(HEAD_DIM)

N_NODES = 4
N_EDGES = 6
SEQ = 8


# ----------------- helpers shared by host prep & reference -----------------
def rotate_half(x):
    half = x.shape[-1] // 2
    return jnp.concatenate([-x[..., half:], x[..., :half]], axis=-1)


def rotary_tables(seq_len, dim, base=ROPE_THETA):
    # == RotaryEmbedding2D._set_cos_sin_cache / forward
    inv_freq = 1.0 / (base ** (jnp.arange(0, dim, 2, dtype=jnp.float32) / dim))
    t = jnp.arange(seq_len, dtype=jnp.float32)
    freqs = jnp.outer(t, inv_freq)                         # (seq, dim/2)
    emb = jnp.concatenate([freqs, freqs], axis=-1)         # (seq, dim)
    return jnp.cos(emb), jnp.sin(emb)


# ----------------- the single fused Pallas kernel -----------------
def gofa_fused_kernel(
    x_ref, xe_ref, wqkv_ref, wkv_e_ref, rope_qkv_ref, prot_qkv_ref,
    rope_ekv_ref, prot_ekv_ref, gather_ref, gtlt_ref, vmask_ref,
    wo_ref, wgu_ref, wd_ref,
    o_ref,
):
    D, H, L, E = HIDDEN, NUM_HEADS, SEQ, N_EDGES
    S = 2 * L                         # merged (node + edge) key length per edge
    HS = H * S                        # 64 head-blocked key lanes

    # ---- input RMSNorm (ln1 folded into wqkv) + fused [Wq|Wk|Wv] projection ----
    x = x_ref[...]                                              # (R, D)
    var = jnp.mean(x * x, axis=-1, keepdims=True)
    xn = x * jax.lax.rsqrt(var + RMS_EPS)
    qkv = jnp.dot(xn, wqkv_ref[...], preferred_element_type=jnp.float32)    # (R, 3D)

    # ---- RoPE on the fused blocks (identity on V lanes; ATTN_SCALE folded
    #      into the q-lane cos/sin); rotate_half is one block-diag matmul ----
    qkv = (qkv * rope_qkv_ref[0]
           + jnp.dot(qkv, prot_qkv_ref[...], preferred_element_type=jnp.float32)
           * rope_qkv_ref[1])

    ekv = jnp.dot(xe_ref[...], wkv_e_ref[...], preferred_element_type=jnp.float32)  # (EL, 2D)
    ekv = (ekv * rope_ekv_ref[0]
           + jnp.dot(ekv, prot_ekv_ref[...], preferred_element_type=jnp.float32)
           * rope_ekv_ref[1])

    q = qkv[:, :D]                    # (R, D)   query rows
    kv = qkv[:, D:]                   # (R, 2D)  [k|v] stays fused for one gather

    # ---- per-edge gathers as one-hot matmuls: q by tgt, fused k|v by src ----
    qe = jnp.dot(gather_ref[0], q, preferred_element_type=jnp.float32)       # (EL, D)
    kve = jnp.dot(gather_ref[1], kv, preferred_element_type=jnp.float32)     # (EL, 2D)

    qe3 = qe.reshape(E, L, D)
    # merged node+edge keys/values (consistent key-axis permutation)
    kvm = jnp.concatenate([kve.reshape(E, L, 2 * D),
                           ekv.reshape(E, L, 2 * D)], axis=1)                # (E, 2L, 2D)
    km = kvm[:, :, :D]                                                       # (E, 2L, D)
    vm = kvm[:, :, D:]                                                       # (E, 2L, D)

    # ---- head blocking on the K/V side (host-precomputed mask) ----
    vmask = vmask_ref[...]                                                   # (H*2L, D)
    kblk = jnp.concatenate([km] * H, axis=1) * vmask[None]                   # (E, H*2L, D)
    vblk = jnp.concatenate([vm] * H, axis=1) * vmask[None]                   # (E, H*2L, D)

    # single score einsum / exp / p@V for all heads and both key paths
    s = jnp.einsum('eld,esd->els', qe3, kblk,
                   preferred_element_type=jnp.float32)                       # (E, L, H*2L)
    m = jnp.max(s)                    # global max: consistent shift within every segment
    p = jnp.exp(s - m)                                                       # (E, L, H*2L)
    num = jnp.einsum('els,esd->eld', p, vblk,
                     preferred_element_type=jnp.float32)                     # (E, L, D)
    den = jnp.dot(p.reshape(E * L, HS), vmask,
                  preferred_element_type=jnp.float32)                        # (EL, D)

    # ---- scatter-add to target nodes: one fused [num|den] push, then normalize ----
    numden = jnp.concatenate([num.reshape(E * L, D), den], axis=1)           # (EL, 2D)
    agg = jnp.dot(gtlt_ref[...], numden, preferred_element_type=jnp.float32)  # (R, 2D)
    attn = agg[:, :D] / (agg[:, D:] + 1e-16)

    # ---- o_proj + residual + RMSNorm (ln2 folded into wgu) + SwiGLU + residual ----
    o = jnp.dot(attn, wo_ref[...], preferred_element_type=jnp.float32)
    h1 = x + o
    var2 = jnp.mean(h1 * h1, axis=-1, keepdims=True)
    hn = h1 * jax.lax.rsqrt(var2 + RMS_EPS)
    gu = jnp.dot(hn, wgu_ref[...], preferred_element_type=jnp.float32)       # (R, 2*INT)
    mlp = jnp.dot(jax.nn.silu(gu[:, :INTERMEDIATE]) * gu[:, INTERMEDIATE:],
                  wd_ref[...], preferred_element_type=jnp.float32)
    o_ref[...] = h1 + mlp


# ----------------- wrapper (host-side weight fusion / tiny one-hot prep) -----------------
def gofa_decoder_layer(x, edge_index, xe, params):
    N, L, D = x.shape
    E = xe.shape[0]
    assert (N, L, D, E) == (N_NODES, SEQ, HIDDEN, N_EDGES)
    H, hd, G = NUM_HEADS, HEAD_DIM, NUM_KV_GROUPS
    src, tgt = edge_index[0], edge_index[1]
    R, RE = N * L, E * L
    f32 = jnp.float32

    x2 = x.reshape(R, D).astype(f32)
    xe2 = xe.reshape(RE, D).astype(f32)

    # fused / GQA-expanded projections; ln1 & ln2 folded as diagonal row scales
    wk_full = jnp.repeat(params["Wk"].reshape(NUM_KV_HEADS, hd, D), G, axis=0).reshape(D, D)
    wv_full = jnp.repeat(params["Wv"].reshape(NUM_KV_HEADS, hd, D), G, axis=0).reshape(D, D)
    wqkv = params["ln1"][:, None] * jnp.concatenate(
        [params["Wq"].T, wk_full.T, wv_full.T], axis=1)                      # (D, 3D)
    wkv_e = jnp.concatenate([wk_full.T, wv_full.T], axis=1)                  # (D, 2D) edge tokens un-normed
    wgu = params["ln2"][:, None] * jnp.concatenate(
        [params["Wg"].T, params["Wu"].T], axis=1)                            # (D, 2*INT)

    # RoPE tables (RotaryEmbedding2D caches) extended over the fused lane layout:
    #   q lanes: query table * ATTN_SCALE, k lanes: node-key (even) / edge-key (odd)
    #   table, v lanes: cos=1, sin=0 (identity).
    cos_q, sin_q = rotary_tables(L, hd)
    cos_k, sin_k = rotary_tables(2 * L, hd)
    cos_qkv = jnp.concatenate([jnp.tile(cos_q, (N, H)) * ATTN_SCALE,
                               jnp.tile(cos_k[0::2], (N, H)),
                               jnp.ones((R, D), f32)], axis=1)
    sin_qkv = jnp.concatenate([jnp.tile(sin_q, (N, H)) * ATTN_SCALE,
                               jnp.tile(sin_k[0::2], (N, H)),
                               jnp.zeros((R, D), f32)], axis=1)
    rope_qkv = jnp.stack([cos_qkv, sin_qkv])                                 # (2, R, 3D)
    cos_ekv = jnp.concatenate([jnp.tile(cos_k[1::2], (E, H)),
                               jnp.ones((RE, D), f32)], axis=1)
    sin_ekv = jnp.concatenate([jnp.tile(sin_k[1::2], (E, H)),
                               jnp.zeros((RE, D), f32)], axis=1)
    rope_ekv = jnp.stack([cos_ekv, sin_ekv])                                 # (2, RE, 2D)

    # rotate-half block-diag matrices, zero on the V lanes
    half = hd // 2
    blk = jnp.block([[jnp.zeros((half, half), f32), jnp.eye(half, dtype=f32)],
                     [-jnp.eye(half, dtype=f32), jnp.zeros((half, half), f32)]])
    protD = jnp.kron(jnp.eye(H, dtype=f32), blk)                             # (D, D)
    Z = jnp.zeros((D, D), f32)
    prot_qkv = jnp.block([[protD, Z, Z], [Z, protD, Z], [Z, Z, Z]])          # (3D, 3D)
    prot_ekv = jnp.block([[protD, Z], [Z, Z]])                               # (2D, 2D)

    # one-hot gather/scatter matrices + K/V head-block mask (from edge_index)
    eye_l = jnp.eye(L, dtype=f32)
    gtl = jnp.kron(jax.nn.one_hot(tgt, N, dtype=f32), eye_l)                 # (EL, R): gather by tgt
    gsl = jnp.kron(jax.nn.one_hot(src, N, dtype=f32), eye_l)                 # (EL, R): gather by src
    gathers = jnp.stack([gtl, gsl])                                          # (2, EL, R)
    gtlt = gtl.T                                                             # (R, EL): scatter-add
    head_row = jnp.repeat(jnp.arange(H), 2 * L)
    head_col = jnp.repeat(jnp.arange(H), hd)
    vmask = (head_row[:, None] == head_col[None, :]).astype(f32)             # (H*2L, D)

    out2 = pl.pallas_call(
        gofa_fused_kernel,
        out_shape=jax.ShapeDtypeStruct((R, D), f32),
    )(x2, xe2, wqkv, wkv_e, rope_qkv, prot_qkv, rope_ekv, prot_ekv,
      gathers, gtlt, vmask, params["Wo"].T, wgu, params["Wd"].T)

    return out2.reshape(N, L, D)


# ----------------- pure-JAX reference (mirrors the PyTorch forward) -----------------
def _rmsnorm_ref(x, w, eps=RMS_EPS):
    var = jnp.mean(x * x, axis=-1, keepdims=True)
    return x * jax.lax.rsqrt(var + eps) * w


def reference_forward(x, edge_index, xe, params):
    N, L, D = x.shape
    E = xe.shape[0]
    src, tgt = edge_index[0], edge_index[1]

    xn = _rmsnorm_ref(x, params["ln1"])
    q = xn @ params["Wq"].T
    k = xn @ params["Wk"].T
    v = xn @ params["Wv"].T
    ek = xe @ params["Wk"].T
    ev = xe @ params["Wv"].T

    q_i, k_j, v_j = q[tgt], k[src], v[src]
    key_states = jnp.stack([k_j, ek], axis=2).reshape(E, 2 * L, KV_DIM)
    value_states = jnp.stack([v_j, ev], axis=2).reshape(E, 2 * L, KV_DIM)
    qs = q_i.reshape(E, L, NUM_HEADS, HEAD_DIM).transpose(0, 2, 1, 3)
    ks = key_states.reshape(E, 2 * L, NUM_KV_HEADS, HEAD_DIM).transpose(0, 2, 1, 3)
    vs = value_states.reshape(E, 2 * L, NUM_KV_HEADS, HEAD_DIM).transpose(0, 2, 1, 3)

    cos_q, sin_q = rotary_tables(L, HEAD_DIM)
    cos_k, sin_k = rotary_tables(2 * L, HEAD_DIM)
    qs = qs * cos_q[None, None] + rotate_half(qs) * sin_q[None, None]
    ks = ks * cos_k[None, None] + rotate_half(ks) * sin_k[None, None]
    ks = jnp.repeat(ks, NUM_KV_GROUPS, axis=1)
    vs = jnp.repeat(vs, NUM_KV_GROUPS, axis=1)

    alpha = qs @ ks.transpose(0, 1, 3, 2) * ATTN_SCALE          # (E,H,L,2L)
    m = jax.ops.segment_max(alpha.max(axis=-1), tgt, num_segments=N)
    p = jnp.exp(alpha - m[tgt][..., None])
    dsum = jax.ops.segment_sum(p.sum(-1), tgt, num_segments=N)
    p = p / (dsum[tgt][..., None] + 1e-16)
    out = p @ vs                                                # (E,H,L,hd)
    out = out.transpose(0, 2, 1, 3).reshape(E, L, D)
    out = jax.ops.segment_sum(out, tgt, num_segments=N)         # aggr='add'
    out = out @ params["Wo"].T

    h1 = x + out
    hn = _rmsnorm_ref(h1, params["ln2"])
    mlp = (jax.nn.silu(hn @ params["Wg"].T) * (hn @ params["Wu"].T)) @ params["Wd"].T
    return h1 + mlp


# ----------------- deterministic parameter init -----------------
def init_params(key):
    ks = jax.random.split(key, 7)
    lin = lambda k, o, i: 0.05 * jax.random.normal(k, (o, i), jnp.float32)
    return {
        "Wq": lin(ks[0], HIDDEN, HIDDEN),
        "Wk": lin(ks[1], KV_DIM, HIDDEN),
        "Wv": lin(ks[2], KV_DIM, HIDDEN),
        "Wo": lin(ks[3], HIDDEN, HIDDEN),
        "Wg": lin(ks[4], INTERMEDIATE, HIDDEN),
        "Wu": lin(ks[5], INTERMEDIATE, HIDDEN),
        "Wd": lin(ks[6], HIDDEN, INTERMEDIATE),
        "ln1": jnp.ones((HIDDEN,), jnp.float32),
        "ln2": jnp.ones((HIDDEN,), jnp.float32),
    }


if __name__ == "__main__":
    key = jax.random.PRNGKey(0)
    kx, ke, kp = jax.random.split(key, 3)
    x = jax.random.normal(kx, (N_NODES, SEQ, HIDDEN), jnp.float32)
    xe = jax.random.normal(ke, (N_EDGES, SEQ, HIDDEN), jnp.float32)
    edge_index = jnp.array([[0, 1, 2, 3, 1, 2],     # src (j)
                            [1, 2, 3, 0, 0, 1]],    # tgt (i)
                           dtype=jnp.int32)
    params = init_params(kp)

    out = gofa_decoder_layer(x, edge_index, xe, params)
    out = jax.block_until_ready(out)

    ref = reference_forward(x, edge_index, xe, params)
    assert out.shape == (N_NODES, SEQ, HIDDEN)
    assert bool(jnp.allclose(out, ref, atol=2e-3, rtol=2e-3)), \
        float(jnp.max(jnp.abs(out - ref)))
    print("KERNEL_OK")
</pallas_src>

<mosaic_0001>
module attributes {stable_mosaic.version = 11 : i64} {
  func.func @gofa_fused_kernel(%arg0: memref<32x32xf32, #tpu.memory_space<vmem>>, %arg1: memref<48x32xf32, #tpu.memory_space<vmem>>, %arg2: memref<32x96xf32, #tpu.memory_space<vmem>>, %arg3: memref<32x64xf32, #tpu.memory_space<vmem>>, %arg4: memref<2x32x96xf32, #tpu.memory_space<vmem>>, %arg5: memref<96x96xf32, #tpu.memory_space<vmem>>, %arg6: memref<2x48x64xf32, #tpu.memory_space<vmem>>, %arg7: memref<64x64xf32, #tpu.memory_space<vmem>>, %arg8: memref<2x48x32xf32, #tpu.memory_space<vmem>>, %arg9: memref<32x48xf32, #tpu.memory_space<vmem>>, %arg10: memref<64x32xf32, #tpu.memory_space<vmem>>, %arg11: memref<32x32xf32, #tpu.memory_space<vmem>>, %arg12: memref<32x128xf32, #tpu.memory_space<vmem>>, %arg13: memref<64x32xf32, #tpu.memory_space<vmem>>, %arg14: memref<32x32xf32, #tpu.memory_space<vmem>>) attributes {dimension_semantics = [], scalar_prefetch = 0 : i64, scratch_operands = 0 : i64, tpu.core_type = #tpu.core_type<tc>} {
    %c0 = arith.constant 0 : index
    %c0_0 = arith.constant 0 : index
    %0 = vector.load %arg0[%c0, %c0_0] : memref<32x32xf32, #tpu.memory_space<vmem>>, vector<32x32xf32>
    %1 = arith.mulf %0, %0 : vector<32x32xf32>
    %cst = arith.constant dense<0.000000e+00> : vector<32xf32>
    %2 = vector.multi_reduction <add>, %1, %cst [1] : vector<32x32xf32> to vector<32xf32>
    %3 = vector.shape_cast %2 : vector<32xf32> to vector<32x1xf32>
    %cst_1 = arith.constant 3.200000e+01 : f32
    %4 = vector.broadcast %cst_1 : f32 to vector<32x1xf32>
    %5 = arith.divf %3, %4 : vector<32x1xf32>
    %cst_2 = arith.constant 9.99999997E-7 : f32
    %6 = vector.broadcast %cst_2 : f32 to vector<32x1xf32>
    %7 = arith.addf %5, %6 : vector<32x1xf32>
    %8 = math.rsqrt %7 : vector<32x1xf32>
    %9 = vector.broadcast %8 : vector<32x1xf32> to vector<32x32xf32>
    %10 = arith.mulf %0, %9 : vector<32x32xf32>
    %c0_3 = arith.constant 0 : index
    %c0_4 = arith.constant 0 : index
    %11 = vector.load %arg2[%c0_3, %c0_4] : memref<32x96xf32, #tpu.memory_space<vmem>>, vector<32x96xf32>
    %cst_5 = arith.constant dense<0.000000e+00> : vector<32x96xf32>
    %12 = tpu.matmul %10, %11, %cst_5 {dimension_numbers = #tpu.dot_dimension_numbers<[1], [0], [0], [1], [0, 0, 1, 1], [], []>} : vector<32x32xf32>, vector<32x96xf32>, vector<32x96xf32> -> vector<32x96xf32>
    %c0_6 = arith.constant 0 : index
    %c0_7 = arith.constant 0 : index
    %c0_8 = arith.constant 0 : index
    %13 = vector.load %arg4[%c0_6, %c0_7, %c0_8] : memref<2x32x96xf32, #tpu.memory_space<vmem>>, vector<1x32x96xf32>
    %14 = vector.shape_cast %13 : vector<1x32x96xf32> to vector<32x96xf32>
    %15 = arith.mulf %12, %14 : vector<32x96xf32>
    %c0_9 = arith.constant 0 : index
    %c0_10 = arith.constant 0 : index
    %16 = vector.load %arg5[%c0_9, %c0_10] : memref<96x96xf32, #tpu.memory_space<vmem>>, vector<96x96xf32>
    %cst_11 = arith.constant dense<0.000000e+00> : vector<32x96xf32>
    %17 = tpu.matmul %12, %16, %cst_11 {dimension_numbers = #tpu.dot_dimension_numbers<[1], [0], [0], [1], [0, 0, 1, 1], [], []>} : vector<32x96xf32>, vector<96x96xf32>, vector<32x96xf32> -> vector<32x96xf32>
    %c1 = arith.constant 1 : index
    %c0_12 = arith.constant 0 : index
    %c0_13 = arith.constant 0 : index
    %18 = vector.load %arg4[%c1, %c0_12, %c0_13] : memref<2x32x96xf32, #tpu.memory_space<vmem>>, vector<1x32x96xf32>
    %19 = vector.shape_cast %18 : vector<1x32x96xf32> to vector<32x96xf32>
    %20 = arith.mulf %17, %19 : vector<32x96xf32>
    %21 = arith.addf %15, %20 : vector<32x96xf32>
    %c0_14 = arith.constant 0 : index
    %c0_15 = arith.constant 0 : index
    %22 = vector.load %arg1[%c0_14, %c0_15] : memref<48x32xf32, #tpu.memory_space<vmem>>, vector<48x32xf32>
    %c0_16 = arith.constant 0 : index
    %c0_17 = arith.constant 0 : index
    %23 = vector.load %arg3[%c0_16, %c0_17] : memref<32x64xf32, #tpu.memory_space<vmem>>, vector<32x64xf32>
    %cst_18 = arith.constant dense<0.000000e+00> : vector<48x64xf32>
    %24 = tpu.matmul %22, %23, %cst_18 {dimension_numbers = #tpu.dot_dimension_numbers<[1], [0], [0], [1], [0, 0, 1, 1], [], []>} : vector<48x32xf32>, vector<32x64xf32>, vector<48x64xf32> -> vector<48x64xf32>
    %c0_19 = arith.constant 0 : index
    %c0_20 = arith.constant 0 : index
    %c0_21 = arith.constant 0 : index
    %25 = vector.load %arg6[%c0_19, %c0_20, %c0_21] : memref<2x48x64xf32, #tpu.memory_space<vmem>>, vector<1x48x64xf32>
    %26 = vector.shape_cast %25 : vector<1x48x64xf32> to vector<48x64xf32>
    %27 = arith.mulf %24, %26 : vector<48x64xf32>
    %c0_22 = arith.constant 0 : index
    %c0_23 = arith.constant 0 : index
    %28 = vector.load %arg7[%c0_22, %c0_23] : memref<64x64xf32, #tpu.memory_space<vmem>>, vector<64x64xf32>
    %cst_24 = arith.constant dense<0.000000e+00> : vector<48x64xf32>
    %29 = tpu.matmul %24, %28, %cst_24 {dimension_numbers = #tpu.dot_dimension_numbers<[1], [0], [0], [1], [0, 0, 1, 1], [], []>} : vector<48x64xf32>, vector<64x64xf32>, vector<48x64xf32> -> vector<48x64xf32>
    %c1_25 = arith.constant 1 : index
    %c0_26 = arith.constant 0 : index
    %c0_27 = arith.constant 0 : index
    %30 = vector.load %arg6[%c1_25, %c0_26, %c0_27] : memref<2x48x64xf32, #tpu.memory_space<vmem>>, vector<1x48x64xf32>
    %31 = vector.shape_cast %30 : vector<1x48x64xf32> to vector<48x64xf32>
    %32 = arith.mulf %29, %31 : vector<48x64xf32>
    %33 = arith.addf %27, %32 : vector<48x64xf32>
    %34 = vector.extract_strided_slice %21 {offsets = [0, 0], sizes = [32, 32], strides = [1, 1]} : vector<32x96xf32> to vector<32x32xf32>
    %35 = vector.extract_strided_slice %21 {offsets = [0, 32], sizes = [32, 64], strides = [1, 1]} : vector<32x96xf32> to vector<32x64xf32>
    %c0_28 = arith.constant 0 : index
    %c0_29 = arith.constant 0 : index
    %c0_30 = arith.constant 0 : index
    %36 = vector.load %arg8[%c0_28, %c0_29, %c0_30] : memref<2x48x32xf32, #tpu.memory_space<vmem>>, vector<1x48x32xf32>
    %37 = vector.shape_cast %36 : vector<1x48x32xf32> to vector<48x32xf32>
    %cst_31 = arith.constant dense<0.000000e+00> : vector<48x32xf32>
    %38 = tpu.matmul %37, %34, %cst_31 {dimension_numbers = #tpu.dot_dimension_numbers<[1], [0], [0], [1], [0, 0, 1, 1], [], []>} : vector<48x32xf32>, vector<32x32xf32>, vector<48x32xf32> -> vector<48x32xf32>
    %c1_32 = arith.constant 1 : index
    %c0_33 = arith.constant 0 : index
    %c0_34 = arith.constant 0 : index
    %39 = vector.load %arg8[%c1_32, %c0_33, %c0_34] : memref<2x48x32xf32, #tpu.memory_space<vmem>>, vector<1x48x32xf32>
    %40 = vector.shape_cast %39 : vector<1x48x32xf32> to vector<48x32xf32>
    %cst_35 = arith.constant dense<0.000000e+00> : vector<48x64xf32>
    %41 = tpu.matmul %40, %35, %cst_35 {dimension_numbers = #tpu.dot_dimension_numbers<[1], [0], [0], [1], [0, 0, 1, 1], [], []>} : vector<48x32xf32>, vector<32x64xf32>, vector<48x64xf32> -> vector<48x64xf32>
    %42 = vector.shape_cast %38 : vector<48x32xf32> to vector<6x8x32xf32>
    %43 = vector.shape_cast %41 : vector<48x64xf32> to vector<6x8x64xf32>
    %44 = vector.shape_cast %33 : vector<48x64xf32> to vector<6x8x64xf32>
    %45 = tpu.concatenate %43, %44 in 1 : vector<6x8x64xf32>, vector<6x8x64xf32> -> vector<6x16x64xf32>
    %46 = vector.extract_strided_slice %45 {offsets = [0, 0, 0], sizes = [6, 16, 32], strides = [1, 1, 1]} : vector<6x16x64xf32> to vector<6x16x32xf32>
    %47 = vector.extract_strided_slice %45 {offsets = [0, 0, 32], sizes = [6, 16, 32], strides = [1, 1, 1]} : vector<6x16x64xf32> to vector<6x16x32xf32>
    %c0_36 = arith.constant 0 : index
    %c0_37 = arith.constant 0 : index
    %48 = vector.load %arg10[%c0_36, %c0_37] : memref<64x32xf32, #tpu.memory_space<vmem>>, vector<64x32xf32>
    %49 = tpu.concatenate %46, %46, %46, %46 in 1 : vector<6x16x32xf32>, vector<6x16x32xf32>, vector<6x16x32xf32>, vector<6x16x32xf32> -> vector<6x64x32xf32>
    %50 = vector.shape_cast %48 : vector<64x32xf32> to vector<1x64x32xf32>
    %51 = vector.broadcast %50 : vector<1x64x32xf32> to vector<6x64x32xf32>
    %52 = arith.mulf %49, %51 : vector<6x64x32xf32>
    %53 = tpu.concatenate %47, %47, %47, %47 in 1 : vector<6x16x32xf32>, vector<6x16x32xf32>, vector<6x16x32xf32>, vector<6x16x32xf32> -> vector<6x64x32xf32>
    %54 = vector.shape_cast %48 : vector<64x32xf32> to vector<1x64x32xf32>
    %55 = vector.broadcast %54 : vector<1x64x32xf32> to vector<6x64x32xf32>
    %56 = arith.mulf %53, %55 : vector<6x64x32xf32>
    "tpu.trace_start"() <{level = 10 : i32, message = "eld,esd->els"}> : () -> ()
    %cst_38 = arith.constant dense<0.000000e+00> : vector<6x8x64xf32>
    %57 = tpu.matmul %42, %52, %cst_38 {dimension_numbers = #tpu.dot_dimension_numbers<[2], [2], [1], [1], [0, 0, 0, 1, 1, 1], [0], [0]>} : vector<6x8x32xf32>, vector<6x64x32xf32>, vector<6x8x64xf32> -> vector<6x8x64xf32>
    "tpu.trace_stop"() : () -> ()
    %58 = vector.shape_cast %57 : vector<6x8x64xf32> to vector<1x6x8x64xf32>
    %cst_39 = arith.constant dense<0xFF800000> : vector<1xf32>
    %59 = vector.multi_reduction <maximumf>, %58, %cst_39 [1, 2, 3] : vector<1x6x8x64xf32> to vector<1xf32>
    %60 = vector.shape_cast %59 : vector<1xf32> to vector<1x1x1x1xf32>
    %61 = vector.extract %60[0, 0, 0, 0] : f32 from vector<1x1x1x1xf32>
    %62 = vector.broadcast %61 : f32 to vector<6x8x64xf32>
    %63 = arith.subf %57, %62 : vector<6x8x64xf32>
    %64 = math.exp %63 : vector<6x8x64xf32>
    "tpu.trace_start"() <{level = 10 : i32, message = "els,esd->eld"}> : () -> ()
    %cst_40 = arith.constant dense<0.000000e+00> : vector<6x8x32xf32>
    %65 = tpu.matmul %64, %56, %cst_40 {dimension_numbers = #tpu.dot_dimension_numbers<[2], [1], [1], [2], [0, 0, 0, 1, 1, 2], [0], [0]>} : vector<6x8x64xf32>, vector<6x64x32xf32>, vector<6x8x32xf32> -> vector<6x8x32xf32>
    "tpu.trace_stop"() : () -> ()
    %66 = vector.shape_cast %64 : vector<6x8x64xf32> to vector<48x64xf32>
    %cst_41 = arith.constant dense<0.000000e+00> : vector<48x32xf32>
    %67 = tpu.matmul %66, %48, %cst_41 {dimension_numbers = #tpu.dot_dimension_numbers<[1], [0], [0], [1], [0, 0, 1, 1], [], []>} : vector<48x64xf32>, vector<64x32xf32>, vector<48x32xf32> -> vector<48x32xf32>
    %68 = vector.shape_cast %65 : vector<6x8x32xf32> to vector<48x32xf32>
    %69 = tpu.concatenate %68, %67 in 1 : vector<48x32xf32>, vector<48x32xf32> -> vector<48x64xf32>
    %c0_42 = arith.constant 0 : index
    %c0_43 = arith.constant 0 : index
    %70 = vector.load %arg9[%c0_42, %c0_43] : memref<32x48xf32, #tpu.memory_space<vmem>>, vector<32x48xf32>
    %cst_44 = arith.constant dense<0.000000e+00> : vector<32x64xf32>
    %71 = tpu.matmul %70, %69, %cst_44 {dimension_numbers = #tpu.dot_dimension_numbers<[1], [0], [0], [1], [0, 0, 1, 1], [], []>} : vector<32x48xf32>, vector<48x64xf32>, vector<32x64xf32> -> vector<32x64xf32>
    %72 = vector.extract_strided_slice %71 {offsets = [0, 0], sizes = [32, 32], strides = [1, 1]} : vector<32x64xf32> to vector<32x32xf32>
    %73 = vector.extract_strided_slice %71 {offsets = [0, 32], sizes = [32, 32], strides = [1, 1]} : vector<32x64xf32> to vector<32x32xf32>
    %cst_45 = arith.constant 1.000000e-16 : f32
    %74 = vector.broadcast %cst_45 : f32 to vector<32x32xf32>
    %75 = arith.addf %73, %74 : vector<32x32xf32>
    %76 = arith.divf %72, %75 : vector<32x32xf32>
    %c0_46 = arith.constant 0 : index
    %c0_47 = arith.constant 0 : index
    %77 = vector.load %arg11[%c0_46, %c0_47] : memref<32x32xf32, #tpu.memory_space<vmem>>, vector<32x32xf32>
    %cst_48 = arith.constant dense<0.000000e+00> : vector<32x32xf32>
    %78 = tpu.matmul %76, %77, %cst_48 {dimension_numbers = #tpu.dot_dimension_numbers<[1], [0], [0], [1], [0, 0, 1, 1], [], []>} : vector<32x32xf32>, vector<32x32xf32>, vector<32x32xf32> -> vector<32x32xf32>
    %79 = arith.addf %0, %78 : vector<32x32xf32>
    %80 = arith.mulf %79, %79 : vector<32x32xf32>
    %cst_49 = arith.constant dense<0.000000e+00> : vector<32xf32>
    %81 = vector.multi_reduction <add>, %80, %cst_49 [1] : vector<32x32xf32> to vector<32xf32>
    %82 = vector.shape_cast %81 : vector<32xf32> to vector<32x1xf32>
    %cst_50 = arith.constant 3.200000e+01 : f32
    %83 = vector.broadcast %cst_50 : f32 to vector<32x1xf32>
    %84 = arith.divf %82, %83 : vector<32x1xf32>
    %cst_51 = arith.constant 9.99999997E-7 : f32
    %85 = vector.broadcast %cst_51 : f32 to vector<32x1xf32>
    %86 = arith.addf %84, %85 : vector<32x1xf32>
    %87 = math.rsqrt %86 : vector<32x1xf32>
    %88 = vector.broadcast %87 : vector<32x1xf32> to vector<32x32xf32>
    %89 = arith.mulf %79, %88 : vector<32x32xf32>
    %c0_52 = arith.constant 0 : index
    %c0_53 = arith.constant 0 : index
    %90 = vector.load %arg12[%c0_52, %c0_53] : memref<32x128xf32, #tpu.memory_space<vmem>>, vector<32x128xf32>
    %cst_54 = arith.constant dense<0.000000e+00> : vector<32x128xf32>
    %91 = tpu.matmul %89, %90, %cst_54 {dimension_numbers = #tpu.dot_dimension_numbers<[1], [0], [0], [1], [0, 0, 1, 1], [], []>} : vector<32x32xf32>, vector<32x128xf32>, vector<32x128xf32> -> vector<32x128xf32>
    %92 = vector.extract_strided_slice %91 {offsets = [0, 0], sizes = [32, 64], strides = [1, 1]} : vector<32x128xf32> to vector<32x64xf32>
    %93 = arith.negf %92 : vector<32x64xf32>
    %94 = math.exp %93 : vector<32x64xf32>
    %cst_55 = arith.constant 1.000000e+00 : f32
    %95 = vector.broadcast %cst_55 : f32 to vector<32x64xf32>
    %96 = arith.addf %95, %94 : vector<32x64xf32>
    %97 = arith.divf %95, %96 : vector<32x64xf32>
    %98 = arith.mulf %92, %97 : vector<32x64xf32>
    %99 = vector.extract_strided_slice %91 {offsets = [0, 64], sizes = [32, 64], strides = [1, 1]} : vector<32x128xf32> to vector<32x64xf32>
    %100 = arith.mulf %98, %99 : vector<32x64xf32>
    %c0_56 = arith.constant 0 : index
    %c0_57 = arith.constant 0 : index
    %101 = vector.load %arg13[%c0_56, %c0_57] : memref<64x32xf32, #tpu.memory_space<vmem>>, vector<64x32xf32>
    %cst_58 = arith.constant dense<0.000000e+00> : vector<32x32xf32>
    %102 = tpu.matmul %100, %101, %cst_58 {dimension_numbers = #tpu.dot_dimension_numbers<[1], [0], [0], [1], [0, 0, 1, 1], [], []>} : vector<32x64xf32>, vector<64x32xf32>, vector<32x32xf32> -> vector<32x32xf32>
    %103 = arith.addf %79, %102 : vector<32x32xf32>
    %c0_59 = arith.constant 0 : index
    %c0_60 = arith.constant 0 : index
    %104 = vector.load %arg14[%c0_59, %c0_60] : memref<32x32xf32, #tpu.memory_space<vmem>>, vector<32x32xf32>
    tpu.vector_store %arg14[%c0_59, %c0_60], %103 {strides = array<i32>} : memref<32x32xf32, #tpu.memory_space<vmem>>, vector<32x32xf32>,
    return
  }
}

</mosaic_0001>

<bundles_post_ra>
// kernel: tpu_custom_call.1
= control target key start
LH: loop header
LB: loop body
LE: loop exit
PB: predicated region body
PF: predicated region fallthrough
CT: control target
= control target key end

     0   :  { %19 = vsyncpa [#allocation3], 0  ;;  %s3490_s0 = inlined_call_operand.vmem [shape: f32[32,32], index: 0, kind: input, shape index: {}]   ;;  %s3491_s1 = inlined_call_operand.vmem [shape: f32[48,32], index: 1, kind: input, shape index: {}]   ;;  %s3492_s2 = inlined_call_operand.hbm [shape: f32[32,96], index: 2, kind: input, shape index: {}]   ;;  %s3493_s3 = inlined_call_operand.hbm [shape: f32[32,64], index: 3, kind: input, shape index: {}]   ;;  %s3494_s4 = inlined_call_operand.vmem [shape: f32[2,32,96], index: 4, kind: input, shape index: {}]   ;;  %s3495_s5 = inlined_call_operand.vmem [shape: f32[96,96], index: 5, kind: input, shape index: {}]   ;;  %s3496_s6 = inlined_call_operand.vmem [shape: f32[2,48,64], index: 6, kind: input, shape index: {}]   ;;  %s3497_s7 = inlined_call_operand.hbm [shape: f32[64,64], index: 7, kind: input, shape index: {}]   ;;  %s3498_s8 = inlined_call_operand.vmem [shape: f32[2,48,32], index: 8, kind: input, shape index: {}]   ;;  %s3499_s9 = inlined_call_operand.hbm [shape: f32[32,48], index: 9, kind: input, shape index: {}]   ;;  %s3500_s10 = inlined_call_operand.vmem [shape: f32[64,32], index: 10, kind: input, shape index: {}]   ;;  %s3501_s11 = inlined_call_operand.hbm [shape: f32[32,32], index: 11, kind: input, shape index: {}]   ;;  %s3502_s12 = inlined_call_operand.hbm [shape: f32[32,128], index: 12, kind: input, shape index: {}]   ;;  %s3503_s13 = inlined_call_operand.vmem [shape: f32[64,32], index: 13, kind: input, shape index: {}]   ;;  %s3504_s14 = inlined_call_operand.hbm [shape: f32[32,32], index: 14, kind: output, shape index: {}]  }
   0x1   :  { %20 = vsyncpa [#allocation6], 0 }
   0x2   :  { %21 = vsyncpa [#allocation9], 0 }
   0x3   :  { %22 = vsyncpa [#allocation12], 0 }
   0x4   :  { %23 = vsyncpa [#allocation4], 0  ;;  %s45_s15 = sshll.u32 %s3493_s3, 4  ;;  %s2482_s16 = smov [#allocation5]   ;;  %s46_s15 = int_to_ptr.hbm [resolvable:$true] %s45_s15 }
   0x5   :  { %s47_s17 = sshll.u32 %s2482_s16, 4  ;;  %s79_s20 = sshll.u32 %s3499_s9, 4  ;;  %s48_s17 = int_to_ptr.vmem [resolvable:$true] %s47_s17  ;;  %s80_s20 = int_to_ptr.hbm [resolvable:$true] %s79_s20 }
   0x6   :  { %s2483_s21 = smov 128   ;;  %s2484_s22 = smov 8  }
   0x7   :  { %53 = dma.hbm_to_vmem [thread:$0]  %s46_s15, 512, %s48_s17, [#allocation6], %s2483_s21, %s2483_s21, %s2484_s22  }
   0x8   :  { %s2485_s23 = smov [#allocation8]   ;;  %s32_s3 = sshll.u32 %s3492_s2, 4  ;;  %s33_s3 = int_to_ptr.hbm [resolvable:$true] %s32_s3 }
   0x9   :  { %s81_s24 = sshll.u32 %s2485_s23, 4  ;;  %s64_s28 = sshll.u32 %s3497_s7, 4  ;;  %s82_s24 = int_to_ptr.vmem [resolvable:$true] %s81_s24  ;;  %s65_s28 = int_to_ptr.hbm [resolvable:$true] %s64_s28 }
   0xa   :  { %87 = dma.hbm_to_vmem [thread:$0]  %s80_s20, 512, %s82_s24, [#allocation9], %s2483_s21, %s2483_s21, %s2484_s22  }
   0xb   :  { %s2486_s29 = smov [#allocation2]   ;;  %s2487_s15 = smov [#allocation7]  }
   0xc   :  { %s34_s30 = sshll.u32 %s2486_s29, 4  ;;  %s66_s2 = sshll.u32 %s2487_s15, 4  ;;  %s35_s30 = int_to_ptr.vmem [resolvable:$true] %s34_s30  ;;  %s67_s2 = int_to_ptr.vmem [resolvable:$true] %s66_s2 }
   0xd   :  { %40 = dma.hbm_to_vmem [thread:$0]  %s33_s3, 512, %s35_s30, [#allocation3], %s2483_s21, %s2483_s21, %s2484_s22  }
   0xe   :  { %s94_s18 = sshll.u32 %s3501_s11, 4  ;;  %s107_s20 = sshll.u32 %s3502_s12, 4  ;;  %s95_s18 = int_to_ptr.hbm [resolvable:$true] %s94_s18  ;;  %s108_s20 = int_to_ptr.hbm [resolvable:$true] %s107_s20 }
   0xf   :  { %72 = dma.hbm_to_vmem [thread:$0]  %s65_s28, 1024, %s67_s2, [#allocation6], %s2483_s21, %s2483_s21, %s2484_s22  }
  0x10   :  { %s2488_s23 = smov [#allocation10]   ;;  %s2489_s25 = smov [#allocation11]  }
  0x11   :  { %s96_s24 = sshll.u32 %s2488_s23, 4  ;;  %s109_s11 = sshll.u32 %s2489_s25, 4  ;;  %s97_s24 = int_to_ptr.vmem [resolvable:$true] %s96_s24  ;;  %s110_s11 = int_to_ptr.vmem [resolvable:$true] %s109_s11 }
  0x12   :  { %102 = dma.hbm_to_vmem [thread:$0]  %s95_s18, 512, %s97_s24, [#allocation9], %s2483_s21, %s2483_s21, %s2484_s22  }
  0x13   :  { %115 = dma.hbm_to_vmem [thread:$0]  %s108_s20, 512, %s110_s11, [#allocation12], %s2483_s21, %s2483_s21, %s2484_s22  }
  0x14   :  { %2472 = dma.done.wait [#allocation3], 512  }
  0x15   :  { %2473 = vsyncadd [#allocation3], 4294966784 }
  0x16   :  { %2474 = dma.done.wait [#allocation6], 1536  }
  0x17   :  { %2475 = vsyncadd [#allocation6], 4294965760 }
  0x18   :  { %2476 = dma.done.wait [#allocation9], 1024  }
  0x19   :  { %2477 = vsyncadd [#allocation9], 4294966272 }
  0x1a   :  { %2478 = dma.done.wait [#allocation12], 512  }
  0x1b   :  { %2479 = vsyncadd [#allocation12], 4294966784  ;;  %v2609_v0 = vld [vmem:[%s3490_s0] sm:$0xff]  ;;  %vm150_vm0 = vcmask 261120   ;;  %v2614_v1 = vld [vmem:[%s3490_s0 + $0x10] sm:$0xff]  ;;  %v2490_v12 = vmov 32.0  }
  0x1c   :  { %v146_v2 = vmul.f32 %v2609_v0, %v2609_v0  ;;  %v148_v3 = vmul.f32 %v2614_v1, %v2614_v1  ;;  %v2623_v4 = vld [vmem:[%s3490_s0 + $0x8] sm:$0xff]  ;;  %v2628_v5 = vld [vmem:[%s3490_s0 + $0x18] sm:$0xff]  ;;  %2246 = vrcp.f32 %v2490_v12  ;;  %v224_v17 = vld [vmem:[#allocation2 + $0x10] sm:$0xff]  ;;  %vm287_vm14 = vcmask 785408   ;;  %s2491_s27 = smov 32  }
  0x1d   :  { %v147_v8 = vmul.f32 %v2623_v4, %v2623_v4  ;;  %v149_v9 = vmul.f32 %v2628_v5, %v2628_v5  ;;  %v225_v15 = vld [vmem:[#allocation2 + $0x18] sm:$0xff]  ;;  %v223_v18 = vld [vmem:[#allocation2 + $0x8] sm:$0xff]  ;;  %v222_v20 = vld [vmem:[#allocation2] sm:$0xff]  ;;  %vm425_vm15 = vcmask 523264  }
  0x1e   :  { %v151_v6 = vsel %vm150_vm0, %v146_v2, 0.0  ;;  %v157_v7 = vsel %vm150_vm0, %v148_v3, 0.0  ;;  %250 = vmatpush.msra.mxu0 %v225_v15  ;;  %v351_v41 = vld [vmem:[#allocation5 + $0x18] sm:$0xff]  ;;  %v350_v42 = vld [vmem:[#allocation5 + $0x10] sm:$0xff]  ;;  %v349_v45 = vld [vmem:[#allocation5 + $0x8] sm:$0xff] }
  0x1f   :  { %152 = vadd.xlane.f32.xlu0 %v151_v6  ;;  %158 = vadd.xlane.f32.xlu1 %v157_v7  ;;  %v154_v10 = vsel %vm150_vm0, %v147_v8, 0.0  ;;  %v160_v11 = vsel %vm150_vm0, %v149_v9, 0.0  ;;  %v286_v46 = vld [vmem:[%s3495_s5 + $0x58] sm:$0xff]  ;;  %v348_v51 = vld [vmem:[#allocation5] sm:$0xff]  ;;  %v285_v59 = vld [vmem:[%s3495_s5 + $0x50] sm:$0xff] }
  0x20   :  { %251 = vmatpush.msra.mxu0 %v224_v17  ;;  %382 = vmatpush.msra.mxu2 %v351_v41  ;;  %v342_v54 = vld [vmem:[%s3491_s1] sm:$0xff]  ;;  %v284_v60 = vld [vmem:[%s3495_s5 + $0x48] sm:$0xff]  ;;  %v282_v3 = vld [vmem:[%s3495_s5 + $0x38] sm:$0xff] }
  0x21   :  { %304 = vmatpush.msra.mxu1 %v286_v46  ;;  %v283_v62 = vld [vmem:[%s3495_s5 + $0x40] sm:$0xff]  ;;  %v343_v7 = vld [vmem:[%s3491_s1 + $0x8] sm:$0xff]  ;;  %v278_v15 = vld [vmem:[%s3495_s5 + $0x18] sm:$0xff] }
  0x22   :  { %v2247_v13 = vpop.eup %2246  ;;  %252 = vmatpush.msra.mxu0 %v223_v18  ;;  %383 = vmatpush.msra.mxu2 %v350_v42  ;;  %v280_v12 = vld [vmem:[%s3495_s5 + $0x28] sm:$0xff]  ;;  %v277_v18 = vld [vmem:[%s3495_s5 + $0x10] sm:$0xff] }
  0x23   :  { %v164_v14 = vmul.f32 32.0, %v2247_v13  ;;  %vm168_vm1 = vweird.f32 %v2247_v13  ;;  %305 = vmatpush.msra.mxu1 %v285_v59  ;;  %v2773_v46 = vld [vmem:[%s3500_s10 + $0x28] sm:$0xff] }
  0x24   :  { %253 = vmatpush.msra.mxu0 %v222_v20  ;;  %384 = vmatpush.msra.mxu2 %v349_v45  ;;  %v276_v20 = vld [vmem:[%s3495_s5 + $0x8] sm:$0xff] }
  0x25   :  { %v165_v16 = vsub.f32 1.0, %v164_v14  ;;  %306 = vmatpush.msra.mxu1 %v284_v60  ;;  %v2768_v45 = vld [vmem:[%s3500_s10 + $0x8] sm:$0xff] }
  0x26   :  { %385 = vmatpush.msra.mxu2 %v348_v51  ;;  %v1961_v51 = vld [vmem:[%s3494_s4 + $0x28] sm:$0xff] }
  0x27   :  { %155 = vadd.xlane.f32.xlu0 %v154_v10  ;;  %161 = vadd.xlane.f32.xlu1 %v160_v11  ;;  %v166_v19 = vmul.f32 %v2247_v13, %v165_v16  ;;  %v281_v11 = vld [vmem:[%s3495_s5 + $0x30] sm:$0xff] }
  0x28   :  { %1964 = vmatmul.msk.f32.vlgmr.msra.gmra.mxu2 %vm150_vm0, %v342_v54  ;;  %307 = vmatpush.msra.mxu1 %v283_v62  ;;  %v344_v16 = vld [vmem:[%s3491_s1 + $0x10] sm:$0xff] }
  0x29   :  { %v167_v21 = vadd.f32 %v2247_v13, %v166_v19  ;;  %v269_v62 = vld [vmem:[%s3494_s4 + $0x10] sm:$0xff] }
  0x2a   :  { %308 = vmatpush.msra.mxu1 %v282_v3 }
  0x2b   :  { %v2638_v22 = vsel %vm168_vm1, %v2247_v13, %v167_v21  ;;  %vm1489_vm1 = vcmask 392192  }
  0x2c   :  { %309 = vmatpush.msra.mxu1 %v281_v11 }
  0x2e   :  { %310 = vmatpush.msra.mxu1 %v280_v12 }
  0x30   :  { %1965 = vmatmul.msk.f32.gmra.mxu2 %vm150_vm0, %v343_v7 }
  0x38   :  { %1966 = vmatmul.msk.f32.gmra.mxu2 %vm150_vm0, %v344_v16  ;;  %v2818_v16 = vld [vmem:[%s3500_s10 + $0x20] sm:$0xff] }
  0x3b   :  { %707 = vrot.lane.b32.xlu0 %v2773_v46, %s2491_s27 }
  0x92   :  { %v153_v23 = vpop.xlane.xlu0 %152  ;;  %v159_v24 = vpop.xlane.xlu1 %158 }
  0x93   :  { %v170_v25 = vmul.f32 %v2638_v22, %v153_v23  ;;  %v172_v26 = vmul.f32 %v2638_v22, %v159_v24  ;;  %v346_v24 = vld [vmem:[%s3491_s1 + $0x20] sm:$0xff] }
  0x95   :  { %v174_v27 = vadd.f32 1e-06, %v170_v25  ;;  %v2642_v28 = vadd.f32 1e-06, %v172_v26  ;;  %v347_v25 = vld [vmem:[%s3491_s1 + $0x28] sm:$0xff]  ;;  %v424_v26 = vld [vmem:[#allocation7 + $0x38] sm:$0xff] }
  0x96   :  { %452 = vmatpush.msra.mxu3 %v424_v26 }
  0x97   :  { %2248 = vrsqrt.f32 %v174_v27  ;;  %vm184_vm3 = vweird.f32 %v174_v27  ;;  %vm204_vm8 = vweird.f32 %v2642_v28 }
  0x98   :  { %2250 = vrsqrt.f32 %v2642_v28 }
  0x9a   :  { %v156_v29 = vpop.xlane.xlu0 %155  ;;  %v162_v30 = vpop.xlane.xlu1 %161 }
  0x9b   :  { %v171_v31 = vmul.f32 %v2638_v22, %v156_v29  ;;  %v173_v32 = vmul.f32 %v2638_v22, %v162_v30  ;;  %v421_v29 = vld [vmem:[#allocation7 + $0x20] sm:$0xff]  ;;  %v420_v30 = vld [vmem:[#allocation7 + $0x18] sm:$0xff] }
  0x9d   :  { %v2249_v33 = vpop.eup %2248  ;;  %v175_v34 = vadd.f32 1e-06, %v171_v31  ;;  %v2647_v35 = vadd.f32 1e-06, %v173_v32  ;;  %v419_v32 = vld [vmem:[#allocation7 + $0x10] sm:$0xff] }
  0x9e   :  { %v179_v36 = vmul.f32 %v2249_v33, %v174_v27  ;;  %v2649_v37 = vpop.eup %2250  ;;  %vm185_vm2 = vweird.f32 %v2249_v33  ;;  %v423_v27 = vld [vmem:[#allocation7 + $0x30] sm:$0xff] }
  0x9f   :  { %2252 = vrsqrt.f32 %v175_v34  ;;  %v199_v40 = vmul.f32 %v2649_v37, %v2642_v28  ;;  %vm186_vm4 = vmor %vm184_vm3, %vm185_vm2  ;;  %vm194_vm6 = vweird.f32 %v175_v34  ;;  %vm205_vm9 = vweird.f32 %v2649_v37  ;;  %v422_v28 = vld [vmem:[#allocation7 + $0x28] sm:$0xff]  ;;  %453 = vmatpush.msra.mxu3 %v423_v27 }
  0xa0   :  { %v180_v38 = vmul.f32 %v2249_v33, %v179_v36  ;;  %2254 = vrsqrt.f32 %v2647_v35  ;;  %vm206_vm10 = vmor %vm204_vm8, %vm205_vm9  ;;  %vm214_vm11 = vweird.f32 %v2647_v35 }
  0xa1   :  { %v200_v47 = vmul.f32 %v2649_v37, %v199_v40  ;;  %454 = vmatpush.msra.mxu3 %v422_v28  ;;  %v405_v28 = vld [vmem:[%s3496_s6] sm:$0xff] }
  0xa2   :  { %v181_v39 = vmul.f32 0.5, %v180_v38 }
  0xa3   :  { %v201_v56 = vmul.f32 0.5, %v200_v47  ;;  %455 = vmatpush.msra.mxu3 %v421_v29  ;;  %v1976_v29 = vld [vmem:[%s3496_s6 + $0x30] sm:$0xff] }
  0xa4   :  { %v182_v43 = vsub.f32 1.5, %v181_v39 }
  0xa5   :  { %v2253_v44 = vpop.eup %2252  ;;  %v202_v63 = vsub.f32 1.5, %v201_v56  ;;  %456 = vmatpush.msra.mxu3 %v420_v30  ;;  %v410_v30 = vld [vmem:[%s3496_s6 + $0x28] sm:$0xff] }
  0xa6   :  { %v189_v48 = vmul.f32 %v2253_v44, %v175_v34  ;;  %v183_v49 = vmul.f32 %v2249_v33, %v182_v43  ;;  %v2658_v50 = vpop.eup %2254  ;;  %vm195_vm5 = vweird.f32 %v2253_v44  ;;  %v417_v34 = vld [vmem:[#allocation7] sm:$0xff] }
  0xa7   :  { %v209_v58 = vmul.f32 %v2658_v50, %v2647_v35  ;;  %vm196_vm7 = vmor %vm194_vm6, %vm195_vm5  ;;  %v203_v10 = vmul.f32 %v2649_v37, %v202_v63  ;;  %vm215_vm12 = vweird.f32 %v2658_v50  ;;  %457 = vmatpush.msra.mxu3 %v419_v32  ;;  %v270_v63 = vld [vmem:[%s3494_s4 + $0x18] sm:$0xff] }
  0xa8   :  { %v190_v52 = vmul.f32 %v2253_v44, %v189_v48  ;;  %v187_v53 = vsel %vm186_vm4, %v2249_v33, %v183_v49  ;;  %vm216_vm13 = vmor %vm214_vm11, %vm215_vm12  ;;  %v418_v33 = vld [vmem:[#allocation7 + $0x8] sm:$0xff]  ;;  %v1960_v48 = vld [vmem:[%s3494_s4 + $0x20] sm:$0xff] }
  0xa9   :  { %v218_v55 = vmul.f32 %v187_v53, %v2609_v0  ;;  %v210_v0 = vmul.f32 %v2658_v50, %v209_v58  ;;  %v207_v14 = vsel %vm206_vm10, %v2649_v37, %v203_v10  ;;  %458 = vmatpush.msra.mxu3 %v418_v33  ;;  %v267_v49 = vld [vmem:[%s3494_s4] sm:$0xff] }
  0xaa   :  { %v191_v57 = vmul.f32 0.5, %v190_v52  ;;  %v220_v17 = vmul.f32 %v207_v14, %v2614_v1  ;;  %v345_v1 = vld [vmem:[%s3491_s1 + $0x18] sm:$0xff] }
  0xab   :  { %1952 = vmatmul.msk.f32.vlgmr.msra.gmra.mxu0 %vm150_vm0, %v218_v55  ;;  %v211_v9 = vmul.f32 0.5, %v210_v0  ;;  %1967 = vmatmul.msk.f32.gmra.mxu2 %vm150_vm0, %v345_v1  ;;  %v2737_v35 = vpop.f32.mrf.mxu2  ;;  %v1963_v0 = vld [vmem:[%s3494_s4 + $0x38] sm:$0xff]  ;;  %v409_v1 = vld [vmem:[%s3496_s6 + $0x20] sm:$0xff] }
  0xac   :  { %v192_v61 = vsub.f32 1.5, %v191_v57  ;;  %459 = vmatpush.msra.mxu3 %v417_v34  ;;  %v411_v32 = vmul.f32 %v405_v28, %v2737_v35  ;;  %v501_v28 = vld [vmem:[%s3498_s8 + $0x18] sm:$0xff] }
  0xad   :  { %v212_v13 = vsub.f32 1.5, %v211_v9  ;;  %1970 = vmatmul.msk.f32.vlgmr.msra.gmra.mxu3 %vm425_vm15, %v2737_v35 }
  0xae   :  { %v193_v2 = vmul.f32 %v2253_v44, %v192_v61  ;;  %v1962_v61 = vld [vmem:[%s3494_s4 + $0x30] sm:$0xff] }
  0xaf   :  { %v213_v19 = vmul.f32 %v2658_v50, %v212_v13  ;;  %v2808_v13 = vld [vmem:[%s3500_s10 + $0x30] sm:$0xff] }
  0xb0   :  { %v197_v6 = vsel %vm196_vm7, %v2253_v44, %v193_v2  ;;  %v2761_v44 = vld [vmem:[%s3500_s10 + $0x38] sm:$0xff] }
  0xb1   :  { %v219_v8 = vmul.f32 %v197_v6, %v2623_v4  ;;  %v279_v4 = vld [vmem:[%s3495_s5 + $0x20] sm:$0xff]  ;;  %v217_v21 = vsel %vm216_vm13, %v2658_v50, %v213_v19  ;;  %711 = vrot.lane.b32.xlu1 %v2761_v44, %s2491_s27  ;;  %v268_v50 = vld [vmem:[%s3494_s4 + $0x8] sm:$0xff] }
  0xb2   :  { %311 = vmatpush.msra.mxu1 %v279_v4  ;;  %v221_v23 = vmul.f32 %v217_v21, %v2628_v5  ;;  %v275_v5 = vld [vmem:[%s3495_s5] sm:$0xff]  ;;  %s2492_s5 = smov 96  }
  0xb3   :  { %1953 = vmatmul.msk.f32.gmra.mxu0 %vm150_vm0, %v219_v8  ;;  %1968 = vmatmul.msk.f32.gmra.mxu2 %vm150_vm0, %v346_v24  ;;  %v2742_v37 = vpop.f32.mrf.mxu2  ;;  %v1980_v24 = vld [vmem:[%s3496_s6 + $0x50] sm:$0xff] }
  0xb4   :  { %312 = vmatpush.msra.mxu1 %v278_v15  ;;  %v408_v15 = vld [vmem:[%s3496_s6 + $0x18] sm:$0xff] }
  0xb5   :  { %1971 = vmatmul.msk.f32.gmra.mxu3 %vm425_vm15, %v2742_v37 }
  0xb6   :  { %313 = vmatpush.msra.mxu1 %v277_v18 }
  0xb8   :  { %314 = vmatpush.msra.mxu1 %v276_v20 }
  0xb9   :  { %699 = vrot.lane.b32.xlu1 %v2768_v45, %s2491_s27 }
  0xba   :  { %315 = vmatpush.msra.mxu1 %v275_v5 }
  0xbb   :  { %1954 = vmatmul.msk.f32.gmra.mxu0 %vm150_vm0, %v220_v17  ;;  %1969 = vmatmul.msk.f32.gmra.mxu2 %vm150_vm0, %v347_v25  ;;  %v2747_v39 = vpop.f32.mrf.mxu2  ;;  %v1979_v17 = vld [vmem:[%s3496_s6 + $0x48] sm:$0xff] }
  0xbd   :  { %1972 = vmatmul.msk.f32.gmra.mxu3 %vm425_vm15, %v2747_v39 }
  0xc3   :  { %1955 = vmatmul.msk.f32.gmra.mxu0 %vm150_vm0, %v221_v23  ;;  %v2833_v23 = vld [vmem:[%s3500_s10 + $0x18] sm:$0xff] }
 0x128   :  { %v255_v31 = vpop.f32.mrf.mxu0 }
 0x129   :  { %1956 = vmatmul.msk.f32.vlgmr.msra.gmra.mxu1 %vm287_vm14, %v255_v31  ;;  %v271_v54 = vmul.f32 %v267_v49, %v255_v31  ;;  %v2851_v31 = vpop.permute.xlu1 %711 }
 0x12e   :  { %v396_v41 = vpop.f32.mrf.mxu2 }
 0x12f   :  { %1973 = vmatmul.msk.f32.gmra.mxu3 %vm425_vm15, %v396_v41  ;;  %v414_v18 = vmul.f32 %v408_v15, %v396_v41  ;;  %v1988_v15 = vld [vmem:[%s3498_s8 + $0x30] sm:$0xff] }
 0x130   :  { %v258_v36 = vpop.f32.mrf.mxu0  ;;  %v461_v12 = vpop.f32.mrf.mxu3 }
 0x131   :  { %1957 = vmatmul.msk.f32.gmra.mxu1 %vm287_vm14, %v258_v36  ;;  %v272_v55 = vmul.f32 %v268_v50, %v258_v36  ;;  %v486_v33 = vmul.f32 %v1976_v29, %v461_v12 }
 0x136   :  { %v399_v42 = vpop.f32.mrf.mxu2 }
 0x137   :  { %1974 = vmatmul.msk.f32.gmra.mxu3 %vm425_vm15, %v399_v42  ;;  %v415_v25 = vmul.f32 %v409_v1, %v399_v42  ;;  %v406_v42 = vld [vmem:[%s3496_s6 + $0x8] sm:$0xff]  ;;  %v2955_v1 = vld [vmem:[%s3500_s10 + $0x10] sm:$0xff] }
 0x138   :  { %v261_v38 = vpop.f32.mrf.mxu0  ;;  %v464_v4 = vpop.f32.mrf.mxu3 }
 0x139   :  { %1958 = vmatmul.msk.f32.gmra.mxu1 %vm287_vm14, %v261_v38  ;;  %v273_v6 = vmul.f32 %v269_v62, %v261_v38  ;;  %v1981_v38 = vld [vmem:[%s3496_s6 + $0x58] sm:$0xff] }
 0x13e   :  { %v2754_v43 = vpop.f32.mrf.mxu2 }
 0x13f   :  { %1975 = vmatmul.msk.f32.gmra.mxu3 %vm425_vm15, %v2754_v43  ;;  %v416_v34 = vmul.f32 %v410_v30, %v2754_v43  ;;  %v412_v43 = vmul.f32 %v406_v42, %v2742_v37 }
 0x140   :  { %v264_v40 = vpop.f32.mrf.mxu0  ;;  %v467_v14 = vpop.f32.mrf.mxu3 }
 0x141   :  { %1959 = vmatmul.msk.f32.gmra.mxu1 %vm287_vm14, %v264_v40  ;;  %v274_v7 = vmul.f32 %v270_v63, %v264_v40  ;;  %v2858_v40 = vadd.f32 %v486_v33, %v411_v32 }
 0x143   :  { %v648_v50 = vmul.f32 %v2761_v44, %v2858_v40 }
 0x145   :  { %2000 = vmatpush.xpose.msk.msrb.mxu2 %vm150_vm0, %v648_v50  ;;  %v503_v50 = vld [vmem:[%s3498_s8 + $0x28] sm:$0xff] }
 0x1a6   :  { %v317_v47 = vpop.f32.mrf.mxu1 }
 0x1a7   :  { %v334_v52 = vmul.f32 %v1960_v48, %v317_v47  ;;  %v1977_v47 = vld [vmem:[%s3496_s6 + $0x38] sm:$0xff]  ;;  %v2868_v48 = vpop.permute.xlu1 %699 }
 0x1a8   :  { %v487_v49 = vmul.f32 %v1977_v47, %v464_v4  ;;  %v502_v47 = vld [vmem:[%s3498_s8 + $0x20] sm:$0xff] }
 0x1a9   :  { %v338_v58 = vadd.f32 %v334_v52, %v271_v54 }
 0x1aa   :  { %v2888_v54 = vadd.f32 %v487_v49, %v412_v43  ;;  %v1992_v49 = vld [vmem:[%s3498_s8 + $0x50] sm:$0xff] }
 0x1ae   :  { %v320_v53 = vpop.f32.mrf.mxu1 }
 0x1af   :  { %v335_v56 = vmul.f32 %v1961_v51, %v320_v53  ;;  %v2875_v51 = vmul.f32 %v2868_v48, %v2858_v40  ;;  %v2883_v53 = vmul.f32 %v2851_v31, %v2858_v40 }
 0x1b1   :  { %v339_v57 = vadd.f32 %v335_v56, %v272_v55  ;;  %v407_v55 = vld [vmem:[%s3496_s6 + $0x10] sm:$0xff]  ;;  %v1978_v56 = vld [vmem:[%s3496_s6 + $0x40] sm:$0xff] }
 0x1b2   :  { %v470_v19 = vpop.f32.mrf.mxu3  ;;  %v488_v62 = vmul.f32 %v1978_v56, %v467_v14 }
 0x1b3   :  { %v2106_v59 = vpack.i.bf16 %v338_v58, %v339_v57  ;;  %v489_v20 = vmul.f32 %v1979_v17, %v470_v19  ;;  %v499_v19 = vld [vmem:[%s3498_s8 + $0x8] sm:$0xff] }
 0x1b5   :  { %v2825_v21 = vadd.f32 %v489_v20, %v414_v18 }
 0x1b6   :  { %v323_v60 = vpop.f32.mrf.mxu1 }
 0x1b7   :  { %v336_v2 = vmul.f32 %v1962_v61, %v323_v60  ;;  %v413_v61 = vmul.f32 %v407_v55, %v2747_v39  ;;  %v1993_v55 = vld [vmem:[%s3498_s8 + $0x58] sm:$0xff] }
 0x1b9   :  { %v340_v9 = vadd.f32 %v336_v2, %v273_v6 }
 0x1ba   :  { %v473_v5 = vpop.f32.mrf.mxu3 }
 0x1bb   :  { %v490_v26 = vmul.f32 %v1980_v24, %v473_v5  ;;  %v1989_v24 = vld [vmem:[%s3498_s8 + $0x38] sm:$0xff] }
 0x1bd   :  { %v2840_v27 = vadd.f32 %v490_v26, %v415_v25  ;;  %v500_v25 = vld [vmem:[%s3498_s8 + $0x10] sm:$0xff]  ;;  %v1990_v26 = vld [vmem:[%s3498_s8 + $0x40] sm:$0xff] }
 0x1be   :  { %v326_v3 = vpop.f32.mrf.mxu1 }
 0x1bf   :  { %v337_v8 = vmul.f32 %v1963_v0, %v326_v3  ;;  %v2912_v0 = vadd.f32 %v488_v62, %v413_v61  ;;  %v2923_v39 = vmul.f32 %v2851_v31, %v2840_v27  ;;  %v2931_v12 = vmul.f32 %v2868_v48, %v2840_v27 }
 0x1c0   :  { %v646_v61 = vmul.f32 %v2773_v46, %v2858_v40 }
 0x1c1   :  { %v341_v10 = vadd.f32 %v337_v8, %v274_v7  ;;  %v664_v2 = vmul.f32 %v2761_v44, %v2912_v0  ;;  %v2919_v7 = vmul.f32 %v2851_v31, %v2825_v21 }
 0x1c2   :  { %v476_v36 = vpop.f32.mrf.mxu3 }
 0x1c3   :  { %534 = vmatpush.msrb.mxu0 %v341_v10  ;;  %v2101_v11 = vpack.i.bf16 %v340_v9, %v341_v10  ;;  %v491_v41 = vmul.f32 %v1981_v38, %v476_v36  ;;  %v1991_v38 = vld [vmem:[%s3498_s8 + $0x48] sm:$0xff] }
 0x1c5   :  { %2102 = vrot.lane.b32.xlu2 %v2101_v11, %s2492_s5  ;;  %535 = vmatpush.msrb.mxu0 %v340_v9  ;;  %v2866_v35 = vadd.f32 %v491_v41, %v416_v34  ;;  %v498_v9 = vld [vmem:[%s3498_s8] sm:$0xff] }
 0x1c7   :  { %536 = vmatpush.msrb.mxu0 %v339_v57  ;;  %v2879_v52 = vmul.f32 %v2868_v48, %v2866_v35  ;;  %v656_v57 = vmul.f32 %v2761_v44, %v2888_v54  ;;  %v688_v18 = vmul.f32 %v2761_v44, %v2866_v35  ;;  %v2979_v29 = vmul.f32 %v2851_v31, %v2866_v35 }
 0x1c9   :  { %537 = vmatpush.msrb.mxu0 %v338_v58  ;;  %v2206_v37 = vpack.i.bf16 %v2875_v51, %v2879_v52  ;;  %v2898_v58 = vpop.permute.xlu0 %707  ;;  %2009 = vmatpush.xpose.msk.msrb.mxu3 %vm150_vm0, %v656_v57 }
 0x1ca   :  { %v2907_v60 = vmul.f32 %v2898_v58, %v2840_v27  ;;  %1982 = vmatmul.msk.f32.vlgmr.msrb.gmra.mxu0 %vm150_vm0, %v498_v9  ;;  %v2935_v4 = vmul.f32 %v2898_v58, %v2866_v35 }
 0x1cb   :  { %2018 = vmatpush.xpose.msk.msra.mxu0 %vm150_vm0, %v664_v2 }
 0x1cc   :  { %v2176_v17 = vpack.i.bf16 %v2935_v4, %v2931_v12  ;;  %v674_v4 = vmul.f32 %v2768_v45, %v2840_v27 }
 0x1cd   :  { %2107 = vrot.lane.b32.xlu2 %v2106_v59, %s2492_s5  ;;  %v2903_v59 = vmul.f32 %v2868_v48, %v2888_v54 }
 0x1cf   :  { %v2151_v63 = vpack.i.bf16 %v2907_v60, %v2903_v59  ;;  %v726_v59 = vmul.f32 %v2898_v58, %v2858_v40 }
 0x1d2   :  { %1983 = vmatmul.msk.f32.gmra.mxu0 %vm150_vm0, %v499_v19 }
 0x1d5   :  { %709 = vrot.lane.b32.xlu2 %v2808_v13, %s2491_s27 }
 0x1da   :  { %1984 = vmatmul.msk.f32.gmra.mxu0 %vm150_vm0, %v500_v25 }
 0x1dd   :  { %705 = vrot.lane.b32.xlu2 %v2818_v16, %s2491_s27 }
 0x1e2   :  { %1985 = vmatmul.msk.f32.gmra.mxu0 %vm150_vm0, %v501_v28 }
 0x1e5   :  { %703 = vrot.lane.b32.xlu2 %v2833_v23, %s2491_s27 }
 0x1ea   :  { %1986 = vmatmul.msk.f32.gmra.mxu0 %vm150_vm0, %v502_v47  ;;  %v652_v47 = vmul.f32 %v2833_v23, %v2888_v54 }
 0x1ed   :  { %701 = vrot.lane.b32.xlu2 %v2955_v1, %s2491_s27 }
 0x1f2   :  { %1987 = vmatmul.msk.f32.gmra.mxu0 %vm150_vm0, %v503_v50  ;;  %v3077_v50 = vld [vmem:[%s3500_s10] sm:$0xff] }
 0x21f   :  { %v2103_v3 = vpop.permute.xlu2 %2102 }
 0x220   :  { %v2104_v6 = vunpack.i.l.bf16 %v2103_v3  ;;  %v2105_v8 = vunpack.i.h.bf16 %v2103_v3 }
 0x222   :  { %610 = vmatpush.msrb.mxu1 %v2104_v6  ;;  %v644_v6 = vmul.f32 %v2833_v23, %v2858_v40 }
 0x224   :  { %611 = vmatpush.msrb.mxu1 %v2105_v8  ;;  %v654_v8 = vmul.f32 %v2773_v46, %v2888_v54 }
 0x227   :  { %v2108_v10 = vpop.permute.xlu2 %2107 }
 0x228   :  { %v2109_v11 = vunpack.i.l.bf16 %v2108_v10  ;;  %v2110_v14 = vunpack.i.h.bf16 %v2108_v10 }
 0x22a   :  { %612 = vmatpush.msrb.mxu1 %v2109_v11  ;;  %v744_v11 = vmul.f32 %v2851_v31, %v2912_v0 }
 0x22c   :  { %613 = vmatpush.msrb.mxu1 %v2110_v14  ;;  %v742_v14 = vmul.f32 %v2898_v58, %v2912_v0 }
 0x22d   :  { %1994 = vmatmul.msk.f32.vlgmr.msrb.gmra.mxu1 %vm150_vm0, %v1988_v15 }
 0x22e   :  { %2045 = vmatpush.xpose.msk.msra.mxu1 %vm150_vm0, %v688_v18 }
 0x22f   :  { %v2949_v20 = vpop.permute.xlu2 %709 }
 0x235   :  { %1995 = vmatmul.msk.f32.gmra.mxu1 %vm150_vm0, %v1989_v24 }
 0x237   :  { %v2967_v5 = vpop.permute.xlu2 %705 }
 0x23d   :  { %1996 = vmatmul.msk.f32.gmra.mxu1 %vm150_vm0, %v1990_v26 }
 0x23f   :  { %v2981_v30 = vpop.permute.xlu2 %703 }
 0x240   :  { %v2985_v32 = vmul.f32 %v2981_v30, %v2840_v27  ;;  %v2989_v33 = vmul.f32 %v2981_v30, %v2858_v40  ;;  %v2993_v34 = vmul.f32 %v2981_v30, %v2866_v35  ;;  %v2997_v36 = vmul.f32 %v2981_v30, %v2888_v54 }
 0x242   :  { %v2161_v41 = vpack.i.bf16 %v2979_v29, %v2985_v32  ;;  %v2191_v42 = vpack.i.bf16 %v2989_v33, %v2993_v34  ;;  %v2141_v43 = vpack.i.bf16 %v2923_v39, %v2997_v36  ;;  %v666_v32 = vmul.f32 %v2768_v45, %v2825_v21 }
 0x243   :  { %v748_v33 = vmul.f32 %v2981_v30, %v2825_v21 }
 0x245   :  { %1997 = vmatmul.msk.f32.gmra.mxu1 %vm150_vm0, %v1991_v38  ;;  %v642_v38 = vmul.f32 %v2768_v45, %v2858_v40 }
 0x247   :  { %v539_v25 = vpop.f32.mrf.mxu0 }
 0x24d   :  { %1998 = vmatmul.msk.f32.gmra.mxu1 %vm150_vm0, %v1992_v49  ;;  %v662_v49 = vmul.f32 %v2773_v46, %v2912_v0 }
 0x255   :  { %1999 = vmatmul.msk.f32.gmra.mxu1 %vm150_vm0, %v1993_v55 }
 0x2aa   :  { %v3025_v56 = vpop.f32.mrf.mxu1 }
 0x2ab   :  { %v647_v57 = vmul.f32 %v2808_v13, %v3025_v56  ;;  %v645_v2 = vmul.f32 %v2818_v16, %v3025_v56  ;;  %v643_v10 = vmul.f32 %v2955_v1, %v3025_v56 }
 0x2ad   :  { %2001 = vmatpush.xpose.msk.msrb.mxu2 %vm150_vm0, %v647_v57 }
 0x2b1   :  { %2002 = vmatpush.xpose.msk.msrb.mxu2 %vm150_vm0, %v646_v61  ;;  %v641_v61 = vmul.f32 %v3077_v50, %v3025_v56 }
 0x2b2   :  { %v3033_v62 = vpop.f32.mrf.mxu1 }
 0x2b3   :  { %v655_v3 = vmul.f32 %v2808_v13, %v3033_v62  ;;  %v653_v15 = vmul.f32 %v2818_v16, %v3033_v62  ;;  %v735_v55 = vmul.f32 %v2949_v20, %v3033_v62 }
 0x2b5   :  { %2003 = vmatpush.xpose.msk.msrb.mxu2 %vm150_vm0, %v645_v2  ;;  %2010 = vmatpush.xpose.msk.msrb.mxu3 %vm150_vm0, %v655_v3  ;;  %v651_v2 = vmul.f32 %v2955_v1, %v3033_v62  ;;  %v736_v3 = vmul.f32 %v2851_v31, %v2888_v54  ;;  %v650_v31 = vmul.f32 %v2768_v45, %v2888_v54 }
 0x2b9   :  { %2004 = vmatpush.xpose.msk.msrb.mxu2 %vm150_vm0, %v644_v6  ;;  %2011 = vmatpush.xpose.msk.msrb.mxu3 %vm150_vm0, %v654_v8  ;;  %v672_v8 = vmul.f32 %v2761_v44, %v2825_v21 }
 0x2ba   :  { %v3047_v9 = vpop.f32.mrf.mxu1 }
 0x2bb   :  { %v663_v18 = vmul.f32 %v2808_v13, %v3047_v9  ;;  %v743_v19 = vmul.f32 %v2949_v20, %v3047_v9  ;;  %v741_v24 = vmul.f32 %v2967_v5, %v3047_v9  ;;  %v661_v6 = vmul.f32 %v2818_v16, %v3047_v9 }
 0x2bd   :  { %2005 = vmatpush.xpose.msk.msrb.mxu2 %vm150_vm0, %v643_v10  ;;  %2012 = vmatpush.xpose.msk.msrb.mxu3 %vm150_vm0, %v653_v15  ;;  %v2111_v26 = vpack.i.bf16 %v743_v19, %v744_v11  ;;  %v2116_v28 = vpack.i.bf16 %v741_v24, %v742_v14  ;;  %v2131_v10 = vpack.i.bf16 %v735_v55, %v736_v3  ;;  %v542_v11 = vpop.f32.mrf.mxu0 }
 0x2be   :  { %2019 = vmatpush.xpose.msk.msra.mxu0 %vm150_vm0, %v663_v18  ;;  %v660_v14 = vmul.f32 %v2833_v23, %v2912_v0  ;;  %v3109_v18 = vpop.permute.xlu2 %701  ;;  %v649_v24 = vmul.f32 %v3077_v50, %v3033_v62 }
 0x2bf   :  { %2112 = vrot.lane.b32.xlu2 %v2111_v26, %s2492_s5  ;;  %2117 = vrot.lane.b32.xlu1 %v2116_v28, %s2492_s5  ;;  %v731_v26 = vmul.f32 %v3109_v18, %v3033_v62 }
 0x2c1   :  { %2006 = vmatpush.xpose.msk.msrb.mxu2 %vm150_vm0, %v642_v38  ;;  %2013 = vmatpush.xpose.msk.msrb.mxu3 %vm150_vm0, %v652_v47  ;;  %v670_v38 = vmul.f32 %v2773_v46, %v2825_v21  ;;  %v680_v47 = vmul.f32 %v2761_v44, %v2840_v27 }
 0x2c2   :  { %2020 = vmatpush.xpose.msk.msra.mxu0 %vm150_vm0, %v662_v49  ;;  %v3084_v57 = vpop.f32.mrf.mxu1 }
 0x2c3   :  { %v671_v15 = vmul.f32 %v2808_v13, %v3084_v57 }
 0x2c5   :  { %2007 = vmatpush.xpose.msk.msrb.mxu2 %vm150_vm0, %v641_v61  ;;  %2014 = vmatpush.xpose.msk.msrb.mxu3 %vm150_vm0, %v651_v2  ;;  %v545_v55 = vpop.f32.mrf.mxu0  ;;  %v658_v61 = vmul.f32 %v2768_v45, %v2912_v0  ;;  %v669_v2 = vmul.f32 %v2818_v16, %v3084_v57 }
 0x2c6   :  { %2021 = vmatpush.xpose.msk.msra.mxu0 %vm150_vm0, %v661_v6 }
 0x2c7   :  { %2132 = vrot.lane.b32.xlu1 %v2131_v10, %s2492_s5  ;;  %v657_v10 = vmul.f32 %v3077_v50, %v3047_v9 }
 0x2c8   :  { %2008 = vmatmul.msk.f32.vlgmr.msrb.gmra.mxu2 %vm150_vm0, %v539_v25  ;;  %v659_v25 = vmul.f32 %v2955_v1, %v3047_v9 }
 0x2c9   :  { %2027 = vmatpush.xpose.msk.msra.mxu2 %vm150_vm0, %v672_v8  ;;  %2015 = vmatpush.xpose.msk.msrb.mxu3 %vm150_vm0, %v650_v31  ;;  %v678_v31 = vmul.f32 %v2773_v46, %v2840_v27 }
 0x2ca   :  { %2022 = vmatpush.xpose.msk.msra.mxu0 %vm150_vm0, %v660_v14  ;;  %v3112_v19 = vpop.f32.mrf.mxu1  ;;  %v686_v14 = vmul.f32 %v2773_v46, %v2866_v35 }
 0x2cb   :  { %v759_v28 = vmul.f32 %v2949_v20, %v3112_v19  ;;  %v679_v3 = vmul.f32 %v2808_v13, %v3112_v19 }
 0x2cd   :  { %2028 = vmatpush.xpose.msk.msra.mxu2 %vm150_vm0, %v671_v15  ;;  %2016 = vmatpush.xpose.msk.msrb.mxu3 %vm150_vm0, %v649_v24  ;;  %v2146_v49 = vpack.i.bf16 %v759_v28, %v731_v26  ;;  %v667_v15 = vmul.f32 %v2955_v1, %v3084_v57  ;;  %v677_v24 = vmul.f32 %v2818_v16, %v3112_v19  ;;  %v548_v26 = vpop.f32.mrf.mxu0 }
 0x2ce   :  { %2023 = vmatpush.xpose.msk.msra.mxu0 %vm150_vm0, %v659_v25  ;;  %v684_v28 = vmul.f32 %v2833_v23, %v2866_v35  ;;  %v665_v25 = vmul.f32 %v3077_v50, %v3084_v57 }
 0x2cf   :  { %2147 = vrot.lane.b32.xlu1 %v2146_v49, %s2492_s5  ;;  %v673_v49 = vmul.f32 %v3077_v50, %v3112_v19 }
 0x2d0   :  { %2017 = vmatmul.msk.f32.vlgmr.msrb.gmra.mxu3 %vm150_vm0, %v542_v11  ;;  %v668_v11 = vmul.f32 %v2833_v23, %v2825_v21 }
 0x2d1   :  { %2029 = vmatpush.xpose.msk.msra.mxu2 %vm150_vm0, %v670_v38  ;;  %2036 = vmatpush.xpose.msk.msra.mxu3 %vm150_vm0, %v680_v47  ;;  %v675_v38 = vmul.f32 %v2955_v1, %v3112_v19 }
 0x2d2   :  { %2024 = vmatpush.xpose.msk.msra.mxu0 %vm150_vm0, %v658_v61  ;;  %v3140_v6 = vpop.f32.mrf.mxu1 }
 0x2d3   :  { %v687_v8 = vmul.f32 %v2808_v13, %v3140_v6  ;;  %v685_v29 = vmul.f32 %v2818_v16, %v3140_v6  ;;  %v683_v47 = vmul.f32 %v2955_v1, %v3140_v6  ;;  %v767_v36 = vmul.f32 %v2949_v20, %v3140_v6 }
 0x2d5   :  { %2030 = vmatpush.xpose.msk.msra.mxu2 %vm150_vm0, %v669_v2  ;;  %2037 = vmatpush.xpose.msk.msra.mxu3 %vm150_vm0, %v679_v3  ;;  %v551_v12 = vpop.f32.mrf.mxu0 }
 0x2d6   :  { %2046 = vmatpush.xpose.msk.msra.mxu1 %vm150_vm0, %v687_v8  ;;  %2025 = vmatpush.xpose.msk.msra.mxu0 %vm150_vm0, %v657_v10 }
 0x2d7   :  { %2162 = vrot.lane.b32.xlu1 %v2161_v41, %s2492_s5  ;;  %v676_v41 = vmul.f32 %v2833_v23, %v2840_v27  ;;  %v681_v27 = vmul.f32 %v3077_v50, %v3140_v6 }
 0x2d9   :  { %2031 = vmatpush.xpose.msk.msra.mxu2 %vm150_vm0, %v668_v11  ;;  %2038 = vmatpush.xpose.msk.msra.mxu3 %vm150_vm0, %v678_v31 }
 0x2da   :  { %2047 = vmatpush.xpose.msk.msra.mxu1 %vm150_vm0, %v686_v14  ;;  %2026 = vmatmul.msk.f32.vlgmr.msra.gmra.mxu0 %vm150_vm0, %v545_v55 }
 0x2dd   :  { %2032 = vmatpush.xpose.msk.msra.mxu2 %vm150_vm0, %v667_v15  ;;  %2039 = vmatpush.xpose.msk.msra.mxu3 %vm150_vm0, %v677_v24  ;;  %v554_v55 = vpop.f32.mrf.mxu0 }
 0x2de   :  { %2048 = vmatpush.xpose.msk.msra.mxu1 %vm150_vm0, %v685_v29 }
 0x2df   :  { %2177 = vrot.lane.b32.xlu1 %v2176_v17, %s2492_s5  ;;  %v682_v17 = vmul.f32 %v2768_v45, %v2866_v35  ;;  %v747_v35 = vmul.f32 %v3109_v18, %v3084_v57 }
 0x2e1   :  { %2033 = vmatpush.xpose.msk.msra.mxu2 %vm150_vm0, %v666_v32  ;;  %2040 = vmatpush.xpose.msk.msra.mxu3 %vm150_vm0, %v676_v41  ;;  %v2221_v34 = vpack.i.bf16 %v747_v35, %v748_v33  ;;  %v733_v33 = vmul.f32 %v2967_v5, %v3033_v62 }
 0x2e2   :  { %2049 = vmatpush.xpose.msk.msra.mxu1 %vm150_vm0, %v684_v28 }
 0x2e5   :  { %2034 = vmatpush.xpose.msk.msra.mxu2 %vm150_vm0, %v665_v25  ;;  %2041 = vmatpush.xpose.msk.msra.mxu3 %vm150_vm0, %v675_v38 }
 0x2e6   :  { %2050 = vmatpush.xpose.msk.msra.mxu1 %vm150_vm0, %v683_v47 }
 0x2e7   :  { %2192 = vrot.lane.b32.xlu1 %v2191_v42, %s2492_s5 }
 0x2e8   :  { %2035 = vmatmul.msk.f32.vlgmr.msra.gmra.mxu2 %vm150_vm0, %v548_v26 }
 0x2e9   :  { %2042 = vmatpush.xpose.msk.msra.mxu3 %vm150_vm0, %v674_v4 }
 0x2ea   :  { %2051 = vmatpush.xpose.msk.msra.mxu1 %vm150_vm0, %v682_v17 }
 0x2ed   :  { %2043 = vmatpush.xpose.msk.msra.mxu3 %vm150_vm0, %v673_v49 }
 0x2ee   :  { %2052 = vmatpush.xpose.msk.msra.mxu1 %vm150_vm0, %v681_v27  ;;  %v739_v27 = vmul.f32 %v3109_v18, %v3047_v9 }
 0x2ef   :  { %2207 = vrot.lane.b32.xlu1 %v2206_v37, %s2492_s5 }
 0x2f0   :  { %2044 = vmatmul.msk.f32.vlgmr.msra.gmra.mxu3 %vm150_vm0, %v551_v12 }
 0x2f1   :  { %2053 = vmatmul.msk.f32.vlgmr.msra.gmra.mxu1 %vm150_vm0, %v554_v55  ;;  %v740_v55 = vmul.f32 %v2981_v30, %v2912_v0  ;;  %v755_v30 = vmul.f32 %v3109_v18, %v3112_v19 }
 0x2f3   :  { %v2121_v35 = vpack.i.bf16 %v739_v27, %v740_v55 }
 0x2f7   :  { %2222 = vrot.lane.b32.xlu1 %v2221_v34, %s2492_s5  ;;  %v734_v34 = vmul.f32 %v2898_v58, %v2888_v54 }
 0x319   :  { %v2113_v42 = vpop.permute.xlu2 %2112 }
 0x31a   :  { %v2114_v61 = vunpack.i.l.bf16 %v2113_v42  ;;  %v2115_v2 = vunpack.i.h.bf16 %v2113_v42  ;;  %v2136_v42 = vpack.i.bf16 %v733_v33, %v734_v34 }
 0x31c   :  { %1243 = vmatpush.msrb.mxu3 %v2114_v61  ;;  %v2166_v61 = vpack.i.bf16 %v755_v30, %v2883_v53  ;;  %v738_v53 = vmul.f32 %v2868_v48, %v2912_v0  ;;  %v723_v30 = vmul.f32 %v3109_v18, %v3025_v56 }
 0x31e   :  { %1244 = vmatpush.msrb.mxu3 %v2115_v2 }
 0x331   :  { %v2118_v3 = vpop.permute.xlu1 %2117 }
 0x332   :  { %v2119_v8 = vunpack.i.l.bf16 %v2118_v3  ;;  %v2120_v51 = vunpack.i.h.bf16 %v2118_v3 }
 0x334   :  { %1245 = vmatpush.msrb.mxu3 %v2119_v8 }
 0x336   :  { %1246 = vmatpush.msrb.mxu3 %v2120_v51 }
 0x339   :  { %v2133_v52 = vpop.permute.xlu1 %2132 }
 0x33a   :  { %v2134_v37 = vunpack.i.l.bf16 %v2133_v52  ;;  %v2135_v10 = vunpack.i.h.bf16 %v2133_v52 }
 0x33c   :  { %1188 = vmatpush.msrb.mxu2 %v2134_v37 }
 0x33e   :  { %1189 = vmatpush.msrb.mxu2 %v2135_v10 }
 0x34b   :  { %v3223_v11 = vpop.f32.mrf.mxu2 }
 0x34c   :  { %v1051_v32 = vsel %vm425_vm15, %v3223_v11, -inf }
 0x353   :  { %v3225_v31 = vpop.f32.mrf.mxu3 }
 0x354   :  { %v1052_v41 = vsel %vm425_vm15, %v3225_v31, -inf }
 0x357   :  { %v3233_v26 = vpop.f32.mrf.mxu0 }
 0x358   :  { %v1053_v12 = vsel %vm425_vm15, %v3233_v26, -inf }
 0x36b   :  { %v3229_v15 = vpop.f32.mrf.mxu2 }
 0x36c   :  { %v1054_v28 = vsel %vm425_vm15, %v3229_v15, -inf }
 0x36d   :  { %v1060_v4 = vmax.f32 %v1053_v12, %v1054_v28 }
 0x36e   :  { %v3227_v14 = vpop.f32.mrf.mxu1 }
 0x36f   :  { %v1057_v24 = vsel %vm425_vm15, %v3227_v14, -inf }
 0x370   :  { %v1058_v38 = vmax.f32 %v1052_v41, %v1057_v24  ;;  %v763_v41 = vmul.f32 %v3109_v18, %v3140_v6  ;;  %v2148_v18 = vpop.permute.xlu1 %2147 }
 0x372   :  { %v2196_v40 = vpack.i.bf16 %v763_v41, %v2919_v7  ;;  %v757_v7 = vmul.f32 %v2967_v5, %v3112_v19 }
 0x373   :  { %v3235_v29 = vpop.f32.mrf.mxu3 }
 0x374   :  { %v1055_v25 = vsel %vm425_vm15, %v3235_v29, -inf }
 0x375   :  { %v1056_v47 = vmax.f32 %v1051_v32, %v1055_v25 }
 0x377   :  { %v1059_v17 = vmax.f32 %v1056_v47, %v1058_v38 }
 0x379   :  { %v1061_v49 = vmax.f32 %v1059_v17, %v1060_v4  ;;  %v750_v4 = vmul.f32 %v2898_v58, %v2825_v21  ;;  %v746_v58 = vmul.f32 %v2868_v48, %v2825_v21  ;;  %v751_v48 = vmul.f32 %v2949_v20, %v3084_v57 }
 0x37b   :  { %1062 = vmax.xlane.f32.xlu0 %v1061_v49 }
 0x38f   :  { %697 = vrot.lane.b32.xlu0 %v3077_v50, %s2491_s27 }
 0x397   :  { %2122 = vrot.lane.b32.xlu0 %v2121_v35, %s2492_s5  ;;  %v765_v35 = vmul.f32 %v2967_v5, %v3140_v6 }
 0x39f   :  { %2137 = vrot.lane.b32.xlu0 %v2136_v42, %s2492_s5  ;;  %v725_v42 = vmul.f32 %v2967_v5, %v3025_v56 }
 0x3a1   :  { %v2186_v21 = vpack.i.bf16 %v725_v42, %v765_v35 }
 0x3a7   :  { %2152 = vrot.lane.b32.xlu0 %v2151_v63, %s2492_s5 }
 0x3af   :  { %2167 = vrot.lane.b32.xlu0 %v2166_v61, %s2492_s5  ;;  %v2201_v61 = vpack.i.bf16 %v751_v48, %v723_v30 }
 0x3ee   :  { %v1063_v2 = vpop.xlane.xlu0 %1062 }
 0x3ef   :  { %v1064_v3 = vrot.slane %v1063_v2, 4 }
 0x3f1   :  { %v1065_v8 = vmax.f32 %v1063_v2, %v1064_v3  ;;  %v749_v2 = vmul.f32 %v2967_v5, %v3084_v57 }
 0x3f3   :  { %v1066_v51 = vrot.slane %v1065_v8, 2 }
 0x3f5   :  { %v1067_v54 = vmax.f32 %v1065_v8, %v1066_v51 }
 0x3f7   :  { %v1068_v52 = vrot.slane %v1067_v54, 1 }
 0x3f9   :  { %v1069_v37 = vmax.f32 %v1067_v54, %v1068_v52 }
 0x3fb   :  { %2086 = vpush %v1069_v37 }
 0x401   :  { %v698_v10 = vpop.permute.xlu0 %697 }
 0x402   :  { %v753_v60 = vmul.f32 %v698_v10, %v3112_v19  ;;  %v737_v63 = vmul.f32 %v698_v10, %v3047_v9  ;;  %v761_v0 = vmul.f32 %v698_v10, %v3140_v6  ;;  %v729_v9 = vmul.f32 %v698_v10, %v3033_v62 }
 0x403   :  { %v745_v39 = vmul.f32 %v698_v10, %v3084_v57  ;;  %v727_v62 = vmul.f32 %v2949_v20, %v3025_v56  ;;  %v721_v6 = vmul.f32 %v698_v10, %v3025_v56 }
 0x404   :  { %v2181_v24 = vpack.i.bf16 %v753_v60, %v726_v59  ;;  %v2126_v32 = vpack.i.bf16 %v737_v63, %v738_v53  ;;  %v2211_v17 = vpack.i.bf16 %v761_v0, %v750_v4  ;;  %v2156_v49 = vpack.i.bf16 %v757_v7, %v729_v9  ;;  %v2163_v60 = vpop.permute.xlu1 %2162 }
 0x405   :  { %v2226_v19 = vpack.i.bf16 %v745_v39, %v746_v58  ;;  %v2171_v55 = vpack.i.bf16 %v727_v62, %v767_v36  ;;  %v2216_v3 = vpack.i.bf16 %v749_v2, %v721_v6  ;;  %v2149_v63 = vunpack.i.l.bf16 %v2148_v18 }
 0x406   :  { %2182 = vrot.lane.b32.xlu0 %v2181_v24, %s2492_s5  ;;  %2127 = vrot.lane.b32.xlu2 %v2126_v32, %s2492_s5 }
 0x409   :  { %v2123_v28 = vpop.permute.xlu0 %2122 }
 0x40a   :  { %v2124_v25 = vunpack.i.l.bf16 %v2123_v28  ;;  %v2125_v38 = vunpack.i.h.bf16 %v2123_v28 }
 0x40c   :  { %1247 = vmatpush.msrb.mxu3 %v2124_v25 }
 0x40e   :  { %2197 = vrot.lane.b32.xlu0 %v2196_v40, %s2492_s5  ;;  %2142 = vrot.lane.b32.xlu2 %v2141_v43, %s2492_s5 }
 0x40f   :  { %1248 = vmatpush.msrb.mxu3 %v2125_v38  ;;  %v2164_v38 = vunpack.i.l.bf16 %v2163_v60 }
 0x411   :  { %v2138_v47 = vpop.permute.xlu0 %2137 }
 0x412   :  { %v2139_v12 = vunpack.i.l.bf16 %v2138_v47  ;;  %v2140_v27 = vunpack.i.h.bf16 %v2138_v47 }
 0x414   :  { %1190 = vmatpush.msrb.mxu2 %v2139_v12 }
 0x416   :  { %2212 = vrot.lane.b32.xlu0 %v2211_v17, %s2492_s5  ;;  %2157 = vrot.lane.b32.xlu2 %v2156_v49, %s2492_s5  ;;  %v2165_v49 = vunpack.i.h.bf16 %v2163_v60 }
 0x417   :  { %1191 = vmatpush.msrb.mxu2 %v2140_v27 }
 0x419   :  { %v3294_v43 = vpop.permute.xlu0 %2152 }
 0x41e   :  { %2227 = vrot.lane.b32.xlu0 %v2226_v19, %s2492_s5  ;;  %2172 = vrot.lane.b32.xlu2 %v2171_v55, %s2492_s5 }
 0x421   :  { %v3304_v33 = vpop.permute.xlu0 %2167 }
 0x422   :  { %v2169_v34 = vunpack.i.l.bf16 %v3304_v33 }
 0x424   :  { %1133 = vmatpush.msrb.mxu0 %v2169_v34 }
 0x426   :  { %2187 = vrot.lane.b32.xlu2 %v2186_v21, %s2492_s5 }
 0x42c   :  { %s2087_s10 = spop %2086 }
 0x42d   :  { %v3319_v8 = vstv %s2087_s10 }
 0x42e   :  { %2202 = vrot.lane.b32.xlu2 %v2201_v61, %s2492_s5  ;;  %v1074_v20 = vsub.f32 %v3233_v26, %v3319_v8  ;;  %v1073_v5 = vsub.f32 %v3225_v31, %v3319_v8  ;;  %v1072_v57 = vsub.f32 %v3223_v11, %v3319_v8  ;;  %v2154_v31 = vunpack.i.l.bf16 %v3294_v43 }
 0x42f   :  { %v1076_v41 = vsub.f32 %v3235_v29, %v3319_v8  ;;  %v2170_v29 = vunpack.i.h.bf16 %v3304_v33  ;;  %v1075_v47 = vsub.f32 %v3229_v15, %v3319_v8 }
 0x430   :  { %v1082_v51 = vmul.f32 1.442695, %v1074_v20  ;;  %v1080_v10 = vmul.f32 1.442695, %v1073_v5  ;;  %v1078_v53 = vmul.f32 1.442695, %v1072_v57 }
 0x431   :  { %v1086_v28 = vmul.f32 1.442695, %v1076_v41  ;;  %v1084_v39 = vmul.f32 1.442695, %v1075_v47 }
 0x432   :  { %2256 = vpow2.f32 %v1082_v51 }
 0x433   :  { %2258 = vpow2.f32 %v1080_v10 }
 0x434   :  { %2260 = vpow2.f32 %v1078_v53 }
 0x435   :  { %2262 = vpow2.f32 %v1086_v28 }
 0x436   :  { %2217 = vrot.lane.b32.xlu2 %v2216_v3, %s2492_s5  ;;  %2264 = vpow2.f32 %v1084_v39  ;;  %v1488_v39 = vld [vmem:[#allocation8 + $0x18] sm:$0xff] }
 0x438   :  { %v3323_v56 = vpop.eup %2256 }
 0x460   :  { %v2128_v54 = vpop.permute.xlu2 %2127 }
 0x461   :  { %v2129_v52 = vunpack.i.l.bf16 %v2128_v54  ;;  %v2130_v37 = vunpack.i.h.bf16 %v2128_v54 }
 0x463   :  { %1249 = vmatpush.msrb.mxu3 %v2129_v52 }
 0x465   :  { %1250 = vmatpush.msrb.mxu3 %v2130_v37 }
 0x466   :  { %2056 = vmatmul.msk.f32.vlgmr.msrb.gmra.mxu3 %vm425_vm15, %v3323_v56 }
 0x467   :  { %1428 = vmatpush.msra.mxu3 %v2761_v44 }
 0x468   :  { %v2143_v26 = vpop.permute.xlu2 %2142 }
 0x469   :  { %v2144_v59 = vunpack.i.l.bf16 %v2143_v26  ;;  %1429 = vmatpush.msra.mxu3 %v2808_v13  ;;  %v2259_v13 = vpop.eup %2258  ;;  %v2145_v24 = vunpack.i.h.bf16 %v2143_v26 }
 0x46a   :  { %v3340_v32 = vpop.eup %2260 }
 0x46b   :  { %1430 = vmatpush.msra.mxu3 %v2773_v46  ;;  %1192 = vmatpush.msrb.mxu2 %v2144_v59  ;;  %v2178_v46 = vpop.permute.xlu1 %2177  ;;  %v2263_v17 = vpop.eup %2262 }
 0x46c   :  { %v2179_v9 = vunpack.i.l.bf16 %v2178_v46  ;;  %v2180_v15 = vunpack.i.h.bf16 %v2178_v46 }
 0x46d   :  { %1431 = vmatpush.msra.mxu3 %v2818_v16  ;;  %1193 = vmatpush.msrb.mxu2 %v2149_v63  ;;  %v2150_v16 = vunpack.i.h.bf16 %v2148_v18 }
 0x46f   :  { %1432 = vmatpush.msra.mxu3 %v2833_v23  ;;  %1194 = vmatpush.msrb.mxu2 %v2154_v31  ;;  %v2155_v23 = vunpack.i.h.bf16 %v3294_v43  ;;  %v1077_v43 = vsub.f32 %v3227_v14, %v3319_v8  ;;  %v2265_v14 = vpop.eup %2264 }
 0x470   :  { %v2158_v44 = vpop.permute.xlu2 %2157 }
 0x471   :  { %v2159_v11 = vunpack.i.l.bf16 %v2158_v44  ;;  %1433 = vmatpush.msra.mxu3 %v2955_v1  ;;  %v2160_v25 = vunpack.i.h.bf16 %v2158_v44  ;;  %v1088_v55 = vmul.f32 1.442695, %v1077_v43 }
 0x473   :  { %1434 = vmatpush.msra.mxu3 %v2768_v45  ;;  %1195 = vmatpush.msrb.mxu2 %v2159_v11  ;;  %2266 = vpow2.f32 %v1088_v55 }
 0x474   :  { %2055 = vmatmul.msk.f32.vlgmr.msrb.gmra.mxu2 %vm425_vm15, %v2259_v13 }
 0x475   :  { %1353 = vmatpush.msra.mxu2 %v2145_v24  ;;  %1435 = vmatpush.msra.mxu3 %v3077_v50  ;;  %v2193_v50 = vpop.permute.xlu1 %2192 }
 0x476   :  { %2060 = vmatmul.msk.f32.vlgmr.msra.gmra.mxu3 %vm425_vm15, %v3340_v32  ;;  %v2195_v27 = vunpack.i.h.bf16 %v2193_v50  ;;  %v2194_v34 = vunpack.i.l.bf16 %v2193_v50 }
 0x477   :  { %1354 = vmatpush.msra.mxu2 %v2150_v16 }
 0x478   :  { %v2173_v45 = vpop.permute.xlu2 %2172  ;;  %v2183_v1 = vpop.permute.xlu0 %2182 }
 0x479   :  { %v2175_v40 = vunpack.i.h.bf16 %v2173_v45  ;;  %1355 = vmatpush.msra.mxu2 %v2155_v23  ;;  %v2184_v0 = vunpack.i.l.bf16 %v2183_v1  ;;  %v2185_v4 = vunpack.i.h.bf16 %v2183_v1  ;;  %v2174_v58 = vunpack.i.l.bf16 %v2173_v45  ;;  %v2267_v3 = vpop.eup %2266 }
 0x47b   :  { %1356 = vmatpush.msra.mxu2 %v2160_v25  ;;  %1134 = vmatpush.msrb.mxu0 %v2175_v40 }
 0x47d   :  { %1357 = vmatpush.msra.mxu2 %v2164_v38  ;;  %1135 = vmatpush.msrb.mxu0 %v2184_v0  ;;  %v2208_v62 = vpop.permute.xlu1 %2207 }
 0x47e   :  { %2061 = vmatmul.msk.f32.gmra.mxu3 %vm425_vm15, %v2259_v13  ;;  %v2210_v42 = vunpack.i.h.bf16 %v2208_v62  ;;  %v2209_v30 = vunpack.i.l.bf16 %v2208_v62 }
 0x47f   :  { %1358 = vmatpush.msra.mxu2 %v2170_v29 }
 0x480   :  { %v2188_v12 = vpop.permute.xlu2 %2187  ;;  %v2198_v36 = vpop.permute.xlu0 %2197 }
 0x481   :  { %v2190_v7 = vunpack.i.h.bf16 %v2188_v12  ;;  %1359 = vmatpush.msra.mxu2 %v2179_v9  ;;  %v2189_v35 = vunpack.i.l.bf16 %v2188_v12  ;;  %v2200_v21 = vunpack.i.h.bf16 %v2198_v36  ;;  %v2199_v8 = vunpack.i.l.bf16 %v2198_v36 }
 0x483   :  { %1360 = vmatpush.msra.mxu2 %v2185_v4  ;;  %1136 = vmatpush.msrb.mxu0 %v2190_v7  ;;  %v1485_v7 = vld [vmem:[#allocation8] sm:$0xff] }
 0x484   :  { %2058 = vmatmul.msk.f32.vlgmr.msra.gmra.mxu2 %vm425_vm15, %v2263_v17 }
 0x485   :  { %1408 = vmatpush.msrb.mxu2 %v2165_v49  ;;  %1137 = vmatpush.msrb.mxu0 %v2195_v27  ;;  %v2223_v18 = vpop.permute.xlu1 %2222  ;;  %v1486_v49 = vld [vmem:[#allocation8 + $0x8] sm:$0xff]  ;;  %v1487_v27 = vld [vmem:[#allocation8 + $0x10] sm:$0xff] }
 0x486   :  { %2062 = vmatmul.msk.f32.gmra.mxu3 %vm425_vm15, %v3323_v56  ;;  %v2224_v52 = vunpack.i.l.bf16 %v2223_v18  ;;  %v2225_v56 = vunpack.i.h.bf16 %v2223_v18 }
 0x487   :  { %1409 = vmatpush.msrb.mxu2 %v2174_v58 }
 0x488   :  { %v2203_v19 = vpop.permute.xlu2 %2202  ;;  %v2213_v48 = vpop.permute.xlu0 %2212 }
 0x489   :  { %1410 = vmatpush.msrb.mxu2 %v2180_v15  ;;  %v2204_v33 = vunpack.i.l.bf16 %v2203_v19  ;;  %v2215_v6 = vunpack.i.h.bf16 %v2213_v48  ;;  %v2205_v20 = vunpack.i.h.bf16 %v2203_v19  ;;  %v2214_v51 = vunpack.i.l.bf16 %v2213_v48 }
 0x48b   :  { %1411 = vmatpush.msrb.mxu2 %v2189_v35  ;;  %1138 = vmatpush.msrb.mxu0 %v2204_v33  ;;  %v1614_v33 = vld [vmem:[#allocation10 + $0x18] sm:$0xff] }
 0x48c   :  { %1639 = vmatpush.msrb.mxu1 %v1614_v33  ;;  %v2302_v33 = vld [vmem:[%s3490_s0 + $0x10] sm:$0xff] }
 0x48d   :  { %1412 = vmatpush.msrb.mxu2 %v2194_v34  ;;  %1139 = vmatpush.msrb.mxu0 %v2210_v42  ;;  %v1613_v34 = vld [vmem:[#allocation10 + $0x10] sm:$0xff]  ;;  %v1612_v42 = vld [vmem:[#allocation10 + $0x8] sm:$0xff] }
 0x48e   :  { %2063 = vmatmul.msk.f32.gmra.mxu3 %vm425_vm15, %v2265_v14  ;;  %1640 = vmatpush.msrb.mxu1 %v1613_v34 }
 0x48f   :  { %1413 = vmatpush.msrb.mxu2 %v2200_v21 }
 0x490   :  { %v2218_v61 = vpop.permute.xlu2 %2217  ;;  %v2228_v37 = vpop.permute.xlu0 %2227  ;;  %1641 = vmatpush.msrb.mxu1 %v1612_v42 }
 0x491   :  { %1414 = vmatpush.msrb.mxu2 %v2209_v30  ;;  %v2219_v2 = vunpack.i.l.bf16 %v2218_v61  ;;  %v2220_v54 = vunpack.i.h.bf16 %v2218_v61  ;;  %v2229_v5 = vunpack.i.l.bf16 %v2228_v37  ;;  %v2230_v57 = vunpack.i.h.bf16 %v2228_v37 }
 0x493   :  { %1415 = vmatpush.msrb.mxu2 %v2215_v6  ;;  %1140 = vmatpush.msrb.mxu0 %v2219_v2 }
 0x494   :  { %2059 = vmatmul.msk.f32.vlgmr.msrb.gmra.mxu2 %vm425_vm15, %v2267_v3  ;;  %2054 = vmatmul.msk.f32.vlgmr.msrb.gmra.mxu0 %vm425_vm15, %v3340_v32 }
 0x495   :  { %1298 = vmatpush.msra.mxu0 %v2199_v8 }
 0x496   :  { %2064 = vmatmul.msk.f32.gmra.mxu3 %vm425_vm15, %v2263_v17 }
 0x497   :  { %1299 = vmatpush.msra.mxu0 %v2205_v20 }
 0x499   :  { %1300 = vmatpush.msra.mxu0 %v2214_v51 }
 0x49b   :  { %1301 = vmatpush.msra.mxu0 %v2220_v54 }
 0x49d   :  { %1302 = vmatpush.msra.mxu0 %v2224_v52 }
 0x49e   :  { %2065 = vmatmul.msk.f32.gmra.mxu3 %vm425_vm15, %v2267_v3 }
 0x49f   :  { %1303 = vmatpush.msra.mxu0 %v2225_v56 }
 0x4a1   :  { %1304 = vmatpush.msra.mxu0 %v2229_v5 }
 0x4a3   :  { %1305 = vmatpush.msra.mxu0 %v2230_v57 }
 0x4a4   :  { %2057 = vmatmul.msk.f32.vlgmr.msra.gmra.mxu0 %vm425_vm15, %v2265_v14  ;;  %v1611_v14 = vld [vmem:[#allocation10] sm:$0xff] }
 0x4a5   :  { %1642 = vmatpush.msrb.mxu1 %v1611_v14 }
 0x4e9   :  { %v1252_v26 = vpop.f32.mrf.mxu3 }
 0x4f7   :  { %v1197_v24 = vpop.f32.mrf.mxu2 }
 0x4f9   :  { %v1437_v10 = vpop.f32.mrf.mxu3 }
 0x501   :  { %v1440_v59 = vpop.f32.mrf.mxu3 }
 0x502   :  { %v2241_v60 = vpack.i.bf16 %v1437_v10, %v1440_v59 }
 0x504   :  { %2242 = vrot.lane.b32.xlu0 %v2241_v60, %s2491_s27 }
 0x507   :  { %v1362_v46 = vpop.f32.mrf.mxu2 }
 0x509   :  { %v1443_v63 = vpop.f32.mrf.mxu3 }
 0x511   :  { %v1446_v53 = vpop.f32.mrf.mxu3  ;;  %v1142_v23 = vpop.f32.mrf.mxu0 }
 0x512   :  { %v2236_v31 = vpack.i.bf16 %v1443_v63, %v1446_v53 }
 0x514   :  { %2237 = vrot.lane.b32.xlu1 %v2236_v31, %s2491_s27 }
 0x517   :  { %v1417_v45 = vpop.f32.mrf.mxu2 }
 0x519   :  { %v1449_v44 = vpop.f32.mrf.mxu3 }
 0x521   :  { %v1452_v11 = vpop.f32.mrf.mxu3  ;;  %v1307_v29 = vpop.f32.mrf.mxu0 }
 0x522   :  { %v2231_v13 = vpack.i.bf16 %v1449_v44, %v1452_v11 }
 0x524   :  { %2232 = vrot.lane.b32.xlu2 %v2231_v13, %s2491_s27 }
 0x576   :  { %v2243_v25 = vpop.permute.xlu0 %2242 }
 0x577   :  { %v2244_v50 = vunpack.i.l.bf16 %v2243_v25  ;;  %v2245_v47 = vunpack.i.h.bf16 %v2243_v25 }
 0x579   :  { %v1480_v4 = vsel %vm150_vm0, %v1197_v24, %v2244_v50  ;;  %v1479_v17 = vsel %vm150_vm0, %v1142_v23, %v2245_v47 }
 0x57e   :  { %v2233_v32 = vpop.permute.xlu2 %2232 }
 0x57f   :  { %v2235_v16 = vunpack.i.h.bf16 %v2233_v32  ;;  %v2234_v41 = vunpack.i.l.bf16 %v2233_v32 }
 0x581   :  { %v1484_v1 = vsel %vm150_vm0, %v1417_v45, %v2234_v41  ;;  %v1483_v28 = vsel %vm150_vm0, %v1362_v46, %v2235_v16 }
 0x582   :  { %1512 = vmatpush.msrb.mxu0 %v1484_v1 }
 0x584   :  { %1513 = vmatpush.msrb.mxu0 %v1483_v28 }
 0x586   :  { %v2238_v40 = vpop.permute.xlu1 %2237 }
 0x587   :  { %v2240_v38 = vunpack.i.h.bf16 %v2238_v40  ;;  %v2239_v0 = vunpack.i.l.bf16 %v2238_v40 }
 0x589   :  { %v1482_v9 = vsel %vm150_vm0, %v1307_v29, %v2239_v0  ;;  %v1481_v12 = vsel %vm150_vm0, %v1252_v26, %v2240_v38 }
 0x58a   :  { %1514 = vmatpush.msrb.mxu0 %v1482_v9 }
 0x58c   :  { %1515 = vmatpush.msrb.mxu0 %v1481_v12 }
 0x58e   :  { %1516 = vmatpush.msrb.mxu0 %v1480_v4 }
 0x590   :  { %1517 = vmatpush.msrb.mxu0 %v1479_v17 }
 0x591   :  { %2066 = vmatmul.msk.f32.vlgmr.msrb.gmra.mxu0 %vm1489_vm1, %v1485_v7 }
 0x599   :  { %2067 = vmatmul.msk.f32.gmra.mxu0 %vm1489_vm1, %v1486_v49 }
 0x5a1   :  { %2068 = vmatmul.msk.f32.gmra.mxu0 %vm1489_vm1, %v1487_v27  ;;  %v2300_v27 = vld [vmem:[%s3490_s0] sm:$0xff] }
 0x5a9   :  { %2069 = vmatmul.msk.f32.gmra.mxu0 %vm1489_vm1, %v1488_v39 }
 0x60e   :  { %v1519_v36 = vpop.f32.mrf.mxu0 }
 0x60f   :  { %v1531_v43 = vadd.f32 1e-16, %v1519_v36 }
 0x611   :  { %1539 = vrot.lane.b32.xlu2 %v1531_v43, %s2492_s5 }
 0x616   :  { %v1522_v58 = vpop.f32.mrf.mxu0 }
 0x617   :  { %v1532_v15 = vadd.f32 1e-16, %v1522_v58 }
 0x619   :  { %1541 = vrot.lane.b32.xlu1 %v1532_v15, %s2492_s5  ;;  %v2301_v15 = vld [vmem:[%s3490_s0 + $0x8] sm:$0xff] }
 0x61e   :  { %v3375_v62 = vpop.f32.mrf.mxu0 }
 0x61f   :  { %v1533_v19 = vadd.f32 1e-16, %v3375_v62 }
 0x621   :  { %1543 = vrot.lane.b32.xlu0 %v1533_v19, %s2492_s5 }
 0x626   :  { %v3379_v55 = vpop.f32.mrf.mxu0 }
 0x627   :  { %v1534_v35 = vadd.f32 1e-16, %v3379_v55 }
 0x629   :  { %1545 = vrot.lane.b32.xlu2 %v1534_v35, %s2492_s5  ;;  %s1936_s5 = sshll.u32 %s3504_s14, 4  ;;  %s1937_s5 = int_to_ptr.hbm [resolvable:$true] %s1936_s5 }
 0x66b   :  { %v1540_v21 = vpop.permute.xlu2 %1539 }
 0x66c   :  { %2268 = vrcp.f32 %v1540_v21  ;;  %v1562_v6 = vand.u32 2147483648, %v1540_v21  ;;  %v1560_v3 = vand.u32 2147483647, %v1540_v21  ;;  %vm1556_vm3 = vweird.f32 %v1540_v21 }
 0x66e   :  { %v1563_v20 = vor.u32 1.1754944e-38, %v1562_v6  ;;  %vm1561_vm5 = vcmp.eq.f32.partialorder %v1560_v3, 8.507059e+37  ;;  %v1730_v3 = vld [vmem:[#allocation11 + $0x10] sm:$0xff] }
 0x672   :  { %v2269_v48 = vpop.eup %2268 }
 0x673   :  { %v1552_v30 = vmul.f32 %v2269_v48, %v1540_v21  ;;  %vm1557_vm2 = vweird.f32 %v2269_v48 }
 0x674   :  { %vm1558_vm4 = vmor %vm1556_vm3, %vm1557_vm2 }
 0x675   :  { %v1553_v61 = vsub.f32 1.0, %v1552_v30 }
 0x677   :  { %v1554_v2 = vmul.f32 %v2269_v48, %v1553_v61 }
 0x679   :  { %v1555_v8 = vadd.f32 %v2269_v48, %v1554_v2  ;;  %v1731_v2 = vld [vmem:[#allocation11 + $0x18] sm:$0xff] }
 0x67a   :  { %1756 = vmatpush.msra.mxu2 %v1731_v2 }
 0x67b   :  { %v1559_v51 = vsel %vm1558_vm4, %v2269_v48, %v1555_v8  ;;  %v2303_v48 = vld [vmem:[%s3490_s0 + $0x18] sm:$0xff]  ;;  %v1729_v8 = vld [vmem:[#allocation11 + $0x8] sm:$0xff]  ;;  %s2493_s0 = smov 64  }
 0x67c   :  { %v1564_v18 = vsel %vm1561_vm5, %v1563_v20, %v1559_v51  ;;  %1757 = vmatpush.msra.mxu2 %v1730_v3  ;;  %v1728_v20 = vld [vmem:[#allocation11] sm:$0xff] }
 0x67d   :  { %v1565_v54 = vmul.f32 %v1564_v18, %v1519_v36 }
 0x67e   :  { %1758 = vmatpush.msra.mxu2 %v1729_v8 }
 0x67f   :  { %2070 = vmatmul.msk.f32.vlgmr.msrb.gmra.mxu1 %vm150_vm0, %v1565_v54 }
 0x680   :  { %1759 = vmatpush.msra.mxu2 %v1728_v20 }
 0x683   :  { %v1546_v52 = vpop.permute.xlu2 %1545 }
 0x684   :  { %vm1601_vm11 = vweird.f32 %v1546_v52  ;;  %v1607_v40 = vand.u32 2147483648, %v1546_v52  ;;  %v1605_v50 = vand.u32 2147483647, %v1546_v52 }
 0x686   :  { %v1608_v12 = vor.u32 1.1754944e-38, %v1607_v40  ;;  %vm1606_vm3 = vcmp.eq.f32.partialorder %v1605_v50, 8.507059e+37 }
 0x68b   :  { %v1542_v37 = vpop.permute.xlu1 %1541 }
 0x68c   :  { %2270 = vrcp.f32 %v1542_v37  ;;  %v1577_v59 = vand.u32 2147483648, %v1542_v37  ;;  %v1575_v53 = vand.u32 2147483647, %v1542_v37  ;;  %vm1571_vm7 = vweird.f32 %v1542_v37 }
 0x68d   :  { %2272 = vrcp.f32 %v1546_v52 }
 0x68e   :  { %v1578_v11 = vor.u32 1.1754944e-38, %v1577_v59  ;;  %vm1576_vm9 = vcmp.eq.f32.partialorder %v1575_v53, 8.507059e+37 }
 0x692   :  { %v2271_v56 = vpop.eup %2270 }
 0x693   :  { %v1567_v5 = vmul.f32 %v2271_v56, %v1542_v37  ;;  %v1544_v57 = vpop.permute.xlu0 %1543  ;;  %v2273_v26 = vpop.eup %2272  ;;  %vm1572_vm6 = vweird.f32 %v2271_v56 }
 0x694   :  { %2274 = vrcp.f32 %v1544_v57  ;;  %v1597_v60 = vmul.f32 %v2273_v26, %v1546_v52  ;;  %vm1573_vm8 = vmor %vm1571_vm7, %vm1572_vm6  ;;  %v1592_v23 = vand.u32 2147483648, %v1544_v57  ;;  %v1590_v28 = vand.u32 2147483647, %v1544_v57 }
 0x695   :  { %v1568_v10 = vsub.f32 1.0, %v1567_v5  ;;  %vm1586_vm12 = vweird.f32 %v1544_v57  ;;  %vm1602_vm13 = vweird.f32 %v2273_v26 }
 0x696   :  { %v1598_v13 = vsub.f32 1.0, %v1597_v60  ;;  %v1593_v38 = vor.u32 1.1754944e-38, %v1592_v23  ;;  %vm1591_vm1 = vcmp.eq.f32.partialorder %v1590_v28, 8.507059e+37  ;;  %vm1603_vm2 = vmor %vm1601_vm11, %vm1602_vm13 }
 0x697   :  { %v1569_v63 = vmul.f32 %v2271_v56, %v1568_v10 }
 0x698   :  { %v1599_v45 = vmul.f32 %v2273_v26, %v1598_v13 }
 0x699   :  { %v1570_v31 = vadd.f32 %v2271_v56, %v1569_v63 }
 0x69a   :  { %v2275_v44 = vpop.eup %2274  ;;  %v1600_v29 = vadd.f32 %v2273_v26, %v1599_v45 }
 0x69b   :  { %v1582_v24 = vmul.f32 %v2275_v44, %v1544_v57  ;;  %v1574_v46 = vsel %vm1573_vm8, %v2271_v56, %v1570_v31  ;;  %vm1587_vm10 = vweird.f32 %v2275_v44 }
 0x69c   :  { %v1579_v32 = vsel %vm1576_vm9, %v1578_v11, %v1574_v46  ;;  %vm1588_vm14 = vmor %vm1586_vm12, %vm1587_vm10  ;;  %v1604_v4 = vsel %vm1603_vm2, %v2273_v26, %v1600_v29 }
 0x69d   :  { %v1583_v16 = vsub.f32 1.0, %v1582_v24  ;;  %v1580_v41 = vmul.f32 %v1579_v32, %v1522_v58  ;;  %v1609_v7 = vsel %vm1606_vm3, %v1608_v12, %v1604_v4 }
 0x69e   :  { %v1610_v17 = vmul.f32 %v1609_v7, %v3379_v55 }
 0x69f   :  { %v1584_v1 = vmul.f32 %v2275_v44, %v1583_v16  ;;  %2071 = vmatmul.msk.f32.gmra.mxu1 %vm150_vm0, %v1580_v41 }
 0x6a1   :  { %v1585_v25 = vadd.f32 %v2275_v44, %v1584_v1 }
 0x6a3   :  { %v1589_v0 = vsel %vm1588_vm14, %v2275_v44, %v1585_v25 }
 0x6a4   :  { %v1594_v9 = vsel %vm1591_vm1, %v1593_v38, %v1589_v0 }
 0x6a5   :  { %v1595_v47 = vmul.f32 %v1594_v9, %v3375_v62 }
 0x6a7   :  { %2072 = vmatmul.msk.f32.gmra.mxu1 %vm150_vm0, %v1595_v47 }
 0x6af   :  { %2073 = vmatmul.msk.f32.gmra.mxu1 %vm150_vm0, %v1610_v17 }
 0x6fc   :  { %v1644_v49 = vpop.f32.mrf.mxu1 }
 0x6fd   :  { %v3392_v39 = vadd.f32 %v2300_v27, %v1644_v49 }
 0x6ff   :  { %v1660_v36 = vmul.f32 %v3392_v39, %v3392_v39 }
 0x701   :  { %v1664_v43 = vsel %vm150_vm0, %v1660_v36, 0.0 }
 0x702   :  { %1665 = vadd.xlane.f32.xlu1 %v1664_v43 }
 0x71c   :  { %v1647_v58 = vpop.f32.mrf.mxu1 }
 0x71d   :  { %v3400_v62 = vadd.f32 %v2301_v15, %v1647_v58 }
 0x71f   :  { %v1661_v19 = vmul.f32 %v3400_v62, %v3400_v62 }
 0x721   :  { %v1667_v55 = vsel %vm150_vm0, %v1661_v19, 0.0 }
 0x722   :  { %1668 = vadd.xlane.f32.xlu0 %v1667_v55  ;;  %v1880_v55 = vld [vmem:[%s3503_s13 + $0x38] sm:$0xff] }
 0x723   :  { %1901 = vmatpush.msra.mxu1 %v1880_v55 }
 0x724   :  { %v1650_v35 = vpop.f32.mrf.mxu1 }
 0x725   :  { %v3408_v34 = vadd.f32 %v2302_v33, %v1650_v35  ;;  %v1879_v35 = vld [vmem:[%s3503_s13 + $0x30] sm:$0xff]  ;;  %v1878_v33 = vld [vmem:[%s3503_s13 + $0x28] sm:$0xff] }
 0x726   :  { %1902 = vmatpush.msra.mxu1 %v1879_v35 }
 0x727   :  { %v1662_v42 = vmul.f32 %v3408_v34, %v3408_v34 }
 0x728   :  { %1903 = vmatpush.msra.mxu1 %v1878_v33 }
 0x729   :  { %v1670_v14 = vsel %vm150_vm0, %v1662_v42, 0.0 }
 0x72a   :  { %1671 = vadd.xlane.f32.xlu2 %v1670_v14  ;;  %v1877_v14 = vld [vmem:[%s3503_s13 + $0x20] sm:$0xff] }
 0x72b   :  { %1904 = vmatpush.msra.mxu1 %v1877_v14 }
 0x72c   :  { %v1653_v21 = vpop.f32.mrf.mxu1 }
 0x72d   :  { %v3416_v30 = vadd.f32 %v2303_v48, %v1653_v21  ;;  %v1876_v21 = vld [vmem:[%s3503_s13 + $0x18] sm:$0xff]  ;;  %v1875_v48 = vld [vmem:[%s3503_s13 + $0x10] sm:$0xff] }
 0x72e   :  { %1905 = vmatpush.msra.mxu1 %v1876_v21 }
 0x72f   :  { %v1663_v61 = vmul.f32 %v3416_v30, %v3416_v30 }
 0x730   :  { %1906 = vmatpush.msra.mxu1 %v1875_v48 }
 0x731   :  { %v1673_v6 = vsel %vm150_vm0, %v1663_v61, 0.0  ;;  %v1874_v61 = vld [vmem:[%s3503_s13 + $0x8] sm:$0xff] }
 0x732   :  { %1674 = vadd.xlane.f32.xlu1 %v1673_v6  ;;  %1907 = vmatpush.msra.mxu1 %v1874_v61 }
 0x775   :  { %v1666_v51 = vpop.xlane.xlu1 %1665 }
 0x776   :  { %v1676_v18 = vmul.f32 %v1666_v51, %v2638_v22  ;;  %v1873_v51 = vld [vmem:[%s3503_s13] sm:$0xff]  ;;  %s2494_s13 = smov [#allocation13]  }
 0x777   :  { %1908 = vmatpush.msra.mxu1 %v1873_v51  ;;  %s1934_s23 = sshll.u32 %s2494_s13, 4  ;;  %s1935_s23 = int_to_ptr.vmem [resolvable:$true] %s1934_s23 }
 0x778   :  { %v1680_v54 = vadd.f32 1e-06, %v1676_v18 }
 0x77a   :  { %2276 = vrsqrt.f32 %v1680_v54  ;;  %vm1690_vm5 = vweird.f32 %v1680_v54 }
 0x780   :  { %v2277_v52 = vpop.eup %2276 }
 0x781   :  { %v1685_v37 = vmul.f32 %v2277_v52, %v1680_v54  ;;  %vm1691_vm4 = vweird.f32 %v2277_v52 }
 0x782   :  { %vm1692_vm6 = vmor %vm1690_vm5, %vm1691_vm4 }
 0x783   :  { %v1686_v56 = vmul.f32 %v2277_v52, %v1685_v37 }
 0x785   :  { %v1687_v5 = vmul.f32 0.5, %v1686_v56 }
 0x787   :  { %v1688_v57 = vsub.f32 1.5, %v1687_v5 }
 0x789   :  { %v1689_v26 = vmul.f32 %v2277_v52, %v1688_v57 }
 0x78b   :  { %v1693_v10 = vsel %vm1692_vm6, %v2277_v52, %v1689_v26 }
 0x78c   :  { %v1724_v59 = vmul.f32 %v1693_v10, %v3392_v39 }
 0x78e   :  { %2074 = vmatmul.msk.f32.vlgmr.msra.gmra.mxu2 %vm150_vm0, %v1724_v59 }
 0x795   :  { %v1669_v60 = vpop.xlane.xlu0 %1668 }
 0x796   :  { %v1677_v63 = vmul.f32 %v1669_v60, %v2638_v22 }
 0x798   :  { %v1681_v53 = vadd.f32 1e-06, %v1677_v63 }
 0x79a   :  { %2278 = vrsqrt.f32 %v1681_v53  ;;  %vm1700_vm8 = vweird.f32 %v1681_v53 }
 0x79d   :  { %v1672_v31 = vpop.xlane.xlu2 %1671 }
 0x79e   :  { %v1678_v44 = vmul.f32 %v1672_v31, %v2638_v22 }
 0x7a0   :  { %v2279_v11 = vpop.eup %2278  ;;  %v1682_v13 = vadd.f32 1e-06, %v1678_v44 }
 0x7a1   :  { %v1695_v24 = vmul.f32 %v2279_v11, %v1681_v53  ;;  %vm1701_vm7 = vweird.f32 %v2279_v11 }
 0x7a2   :  { %2280 = vrsqrt.f32 %v1682_v13  ;;  %vm1702_vm9 = vmor %vm1700_vm8, %vm1701_vm7  ;;  %vm1710_vm11 = vweird.f32 %v1682_v13 }
 0x7a3   :  { %v1696_v46 = vmul.f32 %v2279_v11, %v1695_v24 }
 0x7a5   :  { %v1697_v32 = vmul.f32 0.5, %v1696_v46  ;;  %v1675_v16 = vpop.xlane.xlu1 %1674 }
 0x7a6   :  { %v1679_v41 = vmul.f32 %v1675_v16, %v2638_v22 }
 0x7a7   :  { %v1698_v23 = vsub.f32 1.5, %v1697_v32 }
 0x7a8   :  { %v2281_v45 = vpop.eup %2280  ;;  %v1683_v1 = vadd.f32 1e-06, %v1679_v41 }
 0x7a9   :  { %v1705_v28 = vmul.f32 %v2281_v45, %v1682_v13  ;;  %v1699_v25 = vmul.f32 %v2279_v11, %v1698_v23  ;;  %vm1711_vm10 = vweird.f32 %v2281_v45 }
 0x7aa   :  { %2282 = vrsqrt.f32 %v1683_v1  ;;  %vm1712_vm12 = vmor %vm1710_vm11, %vm1711_vm10  ;;  %vm1720_vm14 = vweird.f32 %v1683_v1 }
 0x7ab   :  { %v1706_v40 = vmul.f32 %v2281_v45, %v1705_v28  ;;  %v1703_v38 = vsel %vm1702_vm9, %v2279_v11, %v1699_v25 }
 0x7ac   :  { %v1725_v0 = vmul.f32 %v1703_v38, %v3400_v62 }
 0x7ad   :  { %v1707_v29 = vmul.f32 0.5, %v1706_v40 }
 0x7ae   :  { %2075 = vmatmul.msk.f32.gmra.mxu2 %vm150_vm0, %v1725_v0 }
 0x7af   :  { %v1708_v50 = vsub.f32 1.5, %v1707_v29 }
 0x7b0   :  { %v2283_v9 = vpop.eup %2282 }
 0x7b1   :  { %v1715_v22 = vmul.f32 %v2283_v9, %v1683_v1  ;;  %v1709_v47 = vmul.f32 %v2281_v45, %v1708_v50  ;;  %vm1721_vm13 = vweird.f32 %v2283_v9 }
 0x7b2   :  { %vm1722_vm1 = vmor %vm1720_vm14, %vm1721_vm13 }
 0x7b3   :  { %v1716_v12 = vmul.f32 %v2283_v9, %v1715_v22  ;;  %v1713_v4 = vsel %vm1712_vm12, %v2281_v45, %v1709_v47 }
 0x7b4   :  { %v1726_v7 = vmul.f32 %v1713_v4, %v3408_v34 }
 0x7b5   :  { %v1717_v17 = vmul.f32 0.5, %v1716_v12 }
 0x7b6   :  { %2076 = vmatmul.msk.f32.gmra.mxu2 %vm150_vm0, %v1726_v7 }
 0x7b7   :  { %v1718_v49 = vsub.f32 1.5, %v1717_v17 }
 0x7b9   :  { %v1719_v27 = vmul.f32 %v2283_v9, %v1718_v49 }
 0x7bb   :  { %v1723_v36 = vsel %vm1722_vm1, %v2283_v9, %v1719_v27 }
 0x7bc   :  { %v1727_v43 = vmul.f32 %v1723_v36, %v3416_v30 }
 0x7be   :  { %2077 = vmatmul.msk.f32.gmra.mxu2 %vm150_vm0, %v1727_v43 }
 0x811   :  { %v1761_v58 = vpop.f32.mrf.mxu2 }
 0x812   :  { %1857 = vrot.lane.b32.xlu0 %v1761_v58, %s2493_s0  ;;  %v2078_v6 = vmul.f32 -1.442695, %v1761_v58 }
 0x814   :  { %2284 = vpow2.f32 %v2078_v6 }
 0x81a   :  { %v2285_v3 = vpop.eup %2284 }
 0x81b   :  { %v1785_v8 = vadd.f32 1.0, %v2285_v3 }
 0x81d   :  { %v1800_v59 = vand.u32 2147483648, %v1785_v8  ;;  %vm1794_vm3 = vweird.f32 %v1785_v8  ;;  %v1798_v63 = vand.u32 2147483647, %v1785_v8 }
 0x81f   :  { %v1801_v44 = vor.u32 1.1754944e-38, %v1800_v59  ;;  %vm1799_vm5 = vcmp.eq.f32.partialorder %v1798_v63, 8.507059e+37 }
 0x831   :  { %v3433_v15 = vpop.f32.mrf.mxu2 }
 0x832   :  { %1859 = vrot.lane.b32.xlu2 %v3433_v15, %s2493_s0  ;;  %v2079_v2 = vmul.f32 -1.442695, %v3433_v15 }
 0x834   :  { %2286 = vpow2.f32 %v2079_v2 }
 0x835   :  { %2288 = vrcp.f32 %v1785_v8 }
 0x839   :  { %v3436_v19 = vpop.f32.mrf.mxu2 }
 0x83a   :  { %1861 = vrot.lane.b32.xlu1 %v3436_v19, %s2493_s0  ;;  %v2287_v20 = vpop.eup %2286  ;;  %v2080_v60 = vmul.f32 -1.442695, %v3436_v19 }
 0x83b   :  { %v1786_v18 = vadd.f32 1.0, %v2287_v20  ;;  %v2289_v54 = vpop.eup %2288 }
 0x83c   :  { %v1790_v52 = vmul.f32 %v2289_v54, %v1785_v8  ;;  %vm1795_vm2 = vweird.f32 %v2289_v54 }
 0x83d   :  { %2290 = vrcp.f32 %v1786_v18  ;;  %vm1796_vm4 = vmor %vm1794_vm3, %vm1795_vm2  ;;  %v1815_v24 = vand.u32 2147483648, %v1786_v18  ;;  %vm1809_vm7 = vweird.f32 %v1786_v18  ;;  %v1813_v16 = vand.u32 2147483647, %v1786_v18 }
 0x83e   :  { %v1791_v37 = vsub.f32 1.0, %v1790_v52  ;;  %2292 = vpow2.f32 %v2080_v60 }
 0x83f   :  { %v1816_v28 = vor.u32 1.1754944e-38, %v1815_v24  ;;  %vm1814_vm9 = vcmp.eq.f32.partialorder %v1813_v16, 8.507059e+37 }
 0x840   :  { %v1792_v5 = vmul.f32 %v2289_v54, %v1791_v37 }
 0x841   :  { %v3448_v42 = vpop.f32.mrf.mxu2 }
 0x842   :  { %1863 = vrot.lane.b32.xlu0 %v3448_v42, %s2493_s0  ;;  %v1793_v26 = vadd.f32 %v2289_v54, %v1792_v5  ;;  %v2081_v46 = vmul.f32 -1.442695, %v3448_v42 }
 0x843   :  { %v2291_v56 = vpop.eup %2290 }
 0x844   :  { %v1805_v57 = vmul.f32 %v2291_v56, %v1786_v18  ;;  %v1797_v53 = vsel %vm1796_vm4, %v2289_v54, %v1793_v26  ;;  %vm1810_vm6 = vweird.f32 %v2291_v56  ;;  %v2293_v23 = vpop.eup %2292  ;;  %2294 = vpow2.f32 %v2081_v46 }
 0x845   :  { %v1802_v11 = vsel %vm1799_vm5, %v1801_v44, %v1797_v53  ;;  %vm1811_vm8 = vmor %vm1809_vm7, %vm1810_vm6  ;;  %v1787_v25 = vadd.f32 1.0, %v2293_v23 }
 0x846   :  { %v1806_v10 = vsub.f32 1.0, %v1805_v57  ;;  %v1849_v32 = vmul.f32 %v1802_v11, %v1761_v58 }
 0x847   :  { %2296 = vrcp.f32 %v1787_v25  ;;  %v1830_v36 = vand.u32 2147483648, %v1787_v25  ;;  %vm1824_vm11 = vweird.f32 %v1787_v25  ;;  %v1828_v43 = vand.u32 2147483647, %v1787_v25 }
 0x848   :  { %v1807_v31 = vmul.f32 %v2291_v56, %v1806_v10 }
 0x849   :  { %v1831_v55 = vor.u32 1.1754944e-38, %v1830_v36  ;;  %vm1829_vm13 = vcmp.eq.f32.partialorder %v1828_v43, 8.507059e+37 }
 0x84a   :  { %v1808_v13 = vadd.f32 %v2291_v56, %v1807_v31  ;;  %v2295_v29 = vpop.eup %2294 }
 0x84b   :  { %v1788_v9 = vadd.f32 1.0, %v2295_v29 }
 0x84c   :  { %v1812_v1 = vsel %vm1811_vm8, %v2291_v56, %v1808_v13 }
 0x84d   :  { %v1817_v40 = vsel %vm1814_vm9, %v1816_v28, %v1812_v1  ;;  %v2297_v22 = vpop.eup %2296  ;;  %2298 = vrcp.f32 %v1788_v9  ;;  %v1845_v14 = vand.u32 2147483648, %v1788_v9  ;;  %vm1839_vm1 = vweird.f32 %v1788_v9 }
 0x84e   :  { %v1850_v38 = vmul.f32 %v1817_v40, %v3433_v15  ;;  %v1820_v47 = vmul.f32 %v2297_v22, %v1787_v25  ;;  %vm1825_vm10 = vweird.f32 %v2297_v22  ;;  %v1843_v21 = vand.u32 2147483647, %v1788_v9 }
 0x84f   :  { %vm1826_vm12 = vmor %vm1824_vm11, %vm1825_vm10  ;;  %v1846_v3 = vor.u32 1.1754944e-38, %v1845_v14 }
 0x850   :  { %v1821_v12 = vsub.f32 1.0, %v1820_v47  ;;  %vm1844_vm3 = vcmp.eq.f32.partialorder %v1843_v21, 8.507059e+37 }
 0x852   :  { %v1822_v17 = vmul.f32 %v2297_v22, %v1821_v12 }
 0x853   :  { %v2299_v4 = vpop.eup %2298 }
 0x854   :  { %v1835_v7 = vmul.f32 %v2299_v4, %v1788_v9  ;;  %v1823_v27 = vadd.f32 %v2297_v22, %v1822_v17  ;;  %vm1840_vm14 = vweird.f32 %v2299_v4 }
 0x855   :  { %vm1841_vm2 = vmor %vm1839_vm1, %vm1840_vm14 }
 0x856   :  { %v1836_v49 = vsub.f32 1.0, %v1835_v7  ;;  %v1827_v15 = vsel %vm1826_vm12, %v2297_v22, %v1823_v27 }
 0x857   :  { %v1832_v35 = vsel %vm1829_vm13, %v1831_v55, %v1827_v15 }
 0x858   :  { %v1837_v58 = vmul.f32 %v2299_v4, %v1836_v49  ;;  %v1851_v48 = vmul.f32 %v1832_v35, %v3436_v19 }
 0x85a   :  { %v1838_v33 = vadd.f32 %v2299_v4, %v1837_v58 }
 0x85c   :  { %v1842_v6 = vsel %vm1841_vm2, %v2299_v4, %v1838_v33 }
 0x85d   :  { %v1847_v8 = vsel %vm1844_vm3, %v1846_v3, %v1842_v6 }
 0x85e   :  { %v1852_v20 = vmul.f32 %v1847_v8, %v3448_v42 }
 0x884   :  { %v1858_v41 = vpop.permute.xlu0 %1857 }
 0x885   :  { %v1869_v45 = vmul.f32 %v1858_v41, %v1849_v32 }
 0x887   :  { %2082 = vmatmul.msk.f32.vlgmr.msra.gmra.mxu1 %vm425_vm15, %v1869_v45 }
 0x88c   :  { %v1860_v0 = vpop.permute.xlu2 %1859 }
 0x88d   :  { %v1870_v50 = vmul.f32 %v1860_v0, %v1850_v38 }
 0x88f   :  { %2083 = vmatmul.msk.f32.gmra.mxu1 %vm425_vm15, %v1870_v50 }
 0x8ac   :  { %v1862_v61 = vpop.permute.xlu1 %1861 }
 0x8ad   :  { %v1871_v2 = vmul.f32 %v1862_v61, %v1851_v48 }
 0x8af   :  { %2084 = vmatmul.msk.f32.gmra.mxu1 %vm425_vm15, %v1871_v2 }
 0x8b4   :  { %v1864_v51 = vpop.permute.xlu0 %1863 }
 0x8b5   :  { %v1872_v18 = vmul.f32 %v1864_v51, %v1852_v20 }
 0x8b7   :  { %2085 = vmatmul.msk.f32.gmra.mxu1 %vm425_vm15, %v1872_v18 }
 0x904   :  { %v1910_v54 = vpop.f32.mrf.mxu1 }
 0x905   :  { %v1922_v52 = vadd.f32 %v1910_v54, %v3392_v39 }
 0x907   :  { %1926 = vst.msk [vmem:[#allocation13] sm:$0xff] %vm150_vm0, %v1922_v52 }
 0x90c   :  { %v1913_v19 = vpop.f32.mrf.mxu1 }
 0x90d   :  { %v1923_v37 = vadd.f32 %v1913_v19, %v3400_v62 }
 0x90f   :  { %1927 = vst.msk [vmem:[#allocation13 + $0x8] sm:$0xff] %vm150_vm0, %v1923_v37 }
 0x92c   :  { %v1916_v56 = vpop.f32.mrf.mxu1 }
 0x92d   :  { %v1924_v5 = vadd.f32 %v1916_v56, %v3408_v34 }
 0x92f   :  { %1928 = vst.msk [vmem:[#allocation13 + $0x10] sm:$0xff] %vm150_vm0, %v1924_v5 }
 0x934   :  { %v1919_v42 = vpop.f32.mrf.mxu1 }
 0x935   :  { %v1925_v39 = vadd.f32 %v1919_v42, %v3416_v30 }
 0x937   :  { %1929 = vst.msk [vmem:[#allocation13 + $0x18] sm:$0xff] %vm150_vm0, %v1925_v39 }
 0x938   :  { %1942 = dma.vmem_to_hbm [thread:$0]  %s1935_s23, 512, %s1937_s5, [#allocation4], %s2483_s21, %s2483_s21, %s2484_s22  }
 0x939   :  { %2480 = dma.done.wait [#allocation4], 512  }
 0x93a   :  { %2481 = vsyncadd [#allocation4], 4294966784 }
 0x93b   :  { %1947 = vsyncpa [#allocation3], 1 }
 0x93c   :  { %1948 = vsyncpa [#allocation6], 1 }
 0x93d   :  { %1949 = vsyncpa [#allocation9], 1 }
 0x93e   :  { %1950 = vsyncpa [#allocation12], 1 }
 0x93f   :  { %1951 = vsyncpa [#allocation4], 1 }

</bundles_post_ra>
